<compile_context>
chip_gen: v7x
topology: tpu7x:2x2x1
jax: 0.10.0
libtpu: 0.0.40
codegen_flags: <defaults>
</compile_context>

<pallas_src>
import jax
import jax.numpy as jnp
from jax import lax
from jax.experimental import pallas as pl
from jax.experimental.pallas import tpu as pltpu

H = 768            # hidden size fixed by the module (combine -> 4*768 = 3072)
LABELS = 4         # `labels` arg of TransformerModel
L_PAD = 128        # lane-dense padded label dim (extra rows/cols are zero)
B = 2              # batch
S_P = 8            # dialogue sequence length
S_H = 8            # hypothesis sequence length
VOCAB_H = 128      # small stand-in vocab for bert-base-uncased
VOCAB_P = 128      # small stand-in vocab for DialoGPT (real module resizes to 50258)


# ----------------------------------------------------------------------------
# Fused head kernel:
#   h_e       = tanh(cls @ pooler_w + pooler_b)           (BERT pooler, fused)
#   dialogues = last_hidden_state.max(dim=1)              (sequence max-pool)
#   ph        = cat([dialogues, h_e, |d - h|, d * h], -1) (done implicitly)
#   logits    = ph @ W.T + b                              (split into 4 MXU dots)
# ----------------------------------------------------------------------------
def head_kernel(cls_ref, d_ref, pw_ref, pb_ref, w_ref, b_ref, o_ref):
    # cls_ref: (B, H)      bf16  BERT [CLS] hidden state (pre-pooler)
    # d_ref:   (B, S, H)   bf16  DialoGPT last_hidden_state
    # pw_ref:  (H, H)      bf16  pooler dense weight (x @ W layout)
    # pb_ref:  (1, H)      f32   pooler bias
    # w_ref:   (L_PAD, 4H) bf16  classifier weight, rows >= LABELS are zero
    # b_ref:   (1, L_PAD)  f32   classifier bias,   cols >= LABELS are zero
    # o_ref:   (B, L_PAD)  f32
    h_e = jnp.tanh(
        jnp.dot(cls_ref[...], pw_ref[...], preferred_element_type=jnp.float32)
        + pb_ref[...])                                          # (B, H) f32

    dmax = jnp.max(d_ref[...].astype(jnp.float32), axis=1)      # (B, H) f32
    diff = jnp.abs(dmax - h_e)
    prod = dmax * h_e

    def chunk_dot(x_f32, start):
        # Static lane-aligned slice of the lane-major weight; transposed-B dot.
        w_chunk = w_ref[:, start:start + H]                     # (L_PAD, H) bf16
        return lax.dot_general(
            x_f32.astype(jnp.bfloat16), w_chunk,
            dimension_numbers=(((1,), (1,)), ((), ())),
            preferred_element_type=jnp.float32)                 # (B, L_PAD) f32

    logits = chunk_dot(dmax, 0)
    logits = logits + chunk_dot(h_e, H)
    logits = logits + chunk_dot(diff, 2 * H)
    logits = logits + chunk_dot(prod, 3 * H)
    o_ref[...] = logits + b_ref[...]


def transformer_head(cls_tok, d_hidden, pooler_w, pooler_b, cls_w, cls_b):
    """cls_w is stored exactly like PyTorch nn.Linear(3072, labels).weight: (labels, 3072)."""
    Bk, Hk = cls_tok.shape
    Lk = cls_w.shape[0]
    # Zero-pad classifier params to a lane-dense 128-wide output slab.
    w_pad = jnp.zeros((L_PAD, 4 * Hk), jnp.float32).at[:Lk].set(cls_w)
    b_pad = jnp.zeros((1, L_PAD), jnp.float32).at[0, :Lk].set(cls_b.reshape(-1))

    vmem = lambda: pl.BlockSpec(memory_space=pltpu.MemorySpace.VMEM)
    out = pl.pallas_call(
        head_kernel,
        out_shape=jax.ShapeDtypeStruct((Bk, L_PAD), jnp.float32),
        in_specs=[vmem() for _ in range(6)],
        out_specs=vmem(),
    )(
        cls_tok.astype(jnp.bfloat16),
        d_hidden.astype(jnp.bfloat16),
        pooler_w.astype(jnp.bfloat16),
        pooler_b.reshape(1, Hk).astype(jnp.float32),
        w_pad.astype(jnp.bfloat16),
        b_pad,
    )
    return out[:, :Lk]


# ----------------------------------------------------------------------------
# Plain-JAX glue: deterministic stand-ins for the pretrained encoders.
# TODO(synk): the real bert-base-uncased / DialoGPT-small transformer stacks
# (and the optional 'hierarchical' LSTM branch) are pretrained HF models and
# are not reproduced here; only their output shapes/semantics are matched.
# ----------------------------------------------------------------------------
def hyp_encoder_cls_stub(h_ids, h_mask, emb):
    # Mimics BERT last_hidden_state[:, 0]; the pooler dense+tanh is fused into
    # the Pallas kernel.
    x = emb[h_ids] * h_mask[..., None]          # (B, S_H, H)
    return x[:, 0, :]                           # (B, H)


def dialogue_encoder_stub(p_ids, emb):
    # Mimics DialoGPT last_hidden_state, shape (B, S_P, H).
    return emb[p_ids]


def forward(params, h_ids, p_ids, h_mask):
    cls_tok = hyp_encoder_cls_stub(h_ids, h_mask, params["bert_emb"])
    d_hidden = dialogue_encoder_stub(p_ids, params["gpt_emb"])
    return transformer_head(cls_tok, d_hidden,
                            params["pooler_w"], params["pooler_b"],
                            params["cls_w"], params["cls_b"])


if __name__ == "__main__":
    key = jax.random.PRNGKey(0)
    k1, k2, k3, k4, k5, k6, k7 = jax.random.split(key, 7)

    params = {
        "bert_emb": 0.02 * jax.random.normal(k1, (VOCAB_H, H), jnp.float32),
        "gpt_emb": 0.02 * jax.random.normal(k2, (VOCAB_P, H), jnp.float32),
        "pooler_w": 0.02 * jax.random.normal(k3, (H, H), jnp.float32),
        "pooler_b": jnp.zeros((H,), jnp.float32),
        # nn.Linear(3072, labels): weight stored in PyTorch layout (labels, 3072)
        # which is exactly the lane-major layout the kernel wants.
        "cls_w": 0.02 * jax.random.normal(k4, (LABELS, 4 * H), jnp.float32),
        "cls_b": 0.01 * jax.random.normal(k5, (LABELS,), jnp.float32),
    }

    h_ids = jax.random.randint(k6, (B, S_H), 0, VOCAB_H, dtype=jnp.int32)
    p_ids = jax.random.randint(k7, (B, S_P), 0, VOCAB_P, dtype=jnp.int32)
    h_mask = jnp.ones((B, S_H), jnp.float32)

    logits = forward(params, h_ids, p_ids, h_mask)
    jax.block_until_ready(logits)

    # Pure-JAX reference with the same bf16 boundary casts the kernel uses.
    cls_tok = hyp_encoder_cls_stub(h_ids, h_mask, params["bert_emb"])
    d = dialogue_encoder_stub(p_ids, params["gpt_emb"])
    h_e = jnp.tanh(
        jnp.dot(cls_tok.astype(jnp.bfloat16),
                params["pooler_w"].astype(jnp.bfloat16),
                preferred_element_type=jnp.float32)
        + params["pooler_b"][None, :])
    dmax = jnp.max(d.astype(jnp.bfloat16).astype(jnp.float32), axis=1)
    ph = jnp.concatenate([dmax, h_e, jnp.abs(dmax - h_e), dmax * h_e], axis=-1)
    ref = (jnp.dot(ph.astype(jnp.bfloat16),
                   params["cls_w"].astype(jnp.bfloat16).T,
                   preferred_element_type=jnp.float32)
           + params["cls_b"][None, :])

    assert logits.shape == (B, LABELS)
    assert jnp.allclose(logits, ref, atol=2e-3, rtol=2e-3), (
        jnp.max(jnp.abs(logits - ref)))

    print("KERNEL_OK")
</pallas_src>

<mosaic_0001>
module attributes {stable_mosaic.version = 11 : i64} {
  func.func @head_kernel(%arg0: memref<2x768xbf16, #tpu.memory_space<vmem>>, %arg1: memref<2x8x768xbf16, #tpu.memory_space<vmem>>, %arg2: memref<768x768xbf16, #tpu.memory_space<vmem>>, %arg3: memref<1x768xf32, #tpu.memory_space<vmem>>, %arg4: memref<128x3072xbf16, #tpu.memory_space<vmem>>, %arg5: memref<1x128xf32, #tpu.memory_space<vmem>>, %arg6: memref<2x128xf32, #tpu.memory_space<vmem>>) attributes {dimension_semantics = [], scalar_prefetch = 0 : i64, scratch_operands = 0 : i64, tpu.core_type = #tpu.core_type<tc>} {
    %c0 = arith.constant 0 : index
    %c0_0 = arith.constant 0 : index
    %0 = vector.load %arg0[%c0, %c0_0] : memref<2x768xbf16, #tpu.memory_space<vmem>>, vector<2x768xbf16>
    %c0_1 = arith.constant 0 : index
    %c0_2 = arith.constant 0 : index
    %1 = vector.load %arg2[%c0_1, %c0_2] : memref<768x768xbf16, #tpu.memory_space<vmem>>, vector<768x768xbf16>
    %cst = arith.constant dense<0.000000e+00> : vector<2x768xf32>
    %2 = tpu.matmul %0, %1, %cst {dimension_numbers = #tpu.dot_dimension_numbers<[1], [0], [0], [1], [0, 0, 1, 1], [], []>} : vector<2x768xbf16>, vector<768x768xbf16>, vector<2x768xf32> -> vector<2x768xf32>
    %c0_3 = arith.constant 0 : index
    %c0_4 = arith.constant 0 : index
    %3 = vector.load %arg3[%c0_3, %c0_4] : memref<1x768xf32, #tpu.memory_space<vmem>>, vector<1x768xf32>
    %4 = vector.broadcast %3 : vector<1x768xf32> to vector<2x768xf32>
    %5 = arith.addf %2, %4 : vector<2x768xf32>
    %6 = math.tanh %5 : vector<2x768xf32>
    %c0_5 = arith.constant 0 : index
    %c0_6 = arith.constant 0 : index
    %c0_7 = arith.constant 0 : index
    %7 = vector.load %arg1[%c0_5, %c0_6, %c0_7] : memref<2x8x768xbf16, #tpu.memory_space<vmem>>, vector<2x8x768xbf16>
    %8 = arith.extf %7 : vector<2x8x768xbf16> to vector<2x8x768xf32>
    %cst_8 = arith.constant dense<0xFF800000> : vector<2x768xf32>
    %9 = vector.multi_reduction <maximumf>, %8, %cst_8 [1] : vector<2x8x768xf32> to vector<2x768xf32>
    %10 = arith.subf %9, %6 : vector<2x768xf32>
    %11 = math.absf %10 : vector<2x768xf32>
    %12 = arith.mulf %9, %6 : vector<2x768xf32>
    %c0_9 = arith.constant 0 : index
    %c0_10 = arith.constant 0 : index
    %13 = vector.load %arg4[%c0_9, %c0_10] : memref<128x3072xbf16, #tpu.memory_space<vmem>>, vector<128x768xbf16>
    %14 = arith.truncf %9 : vector<2x768xf32> to vector<2x768xbf16>
    %cst_11 = arith.constant dense<0.000000e+00> : vector<2x128xf32>
    %15 = tpu.matmul %14, %13, %cst_11 {dimension_numbers = #tpu.dot_dimension_numbers<[1], [1], [0], [0], [0, 0, 1, 0], [], []>} : vector<2x768xbf16>, vector<128x768xbf16>, vector<2x128xf32> -> vector<2x128xf32>
    %c0_12 = arith.constant 0 : index
    %c768 = arith.constant 768 : index
    %16 = vector.load %arg4[%c0_12, %c768] : memref<128x3072xbf16, #tpu.memory_space<vmem>>, vector<128x768xbf16>
    %17 = arith.truncf %6 : vector<2x768xf32> to vector<2x768xbf16>
    %cst_13 = arith.constant dense<0.000000e+00> : vector<2x128xf32>
    %18 = tpu.matmul %17, %16, %cst_13 {dimension_numbers = #tpu.dot_dimension_numbers<[1], [1], [0], [0], [0, 0, 1, 0], [], []>} : vector<2x768xbf16>, vector<128x768xbf16>, vector<2x128xf32> -> vector<2x128xf32>
    %19 = arith.addf %15, %18 : vector<2x128xf32>
    %c0_14 = arith.constant 0 : index
    %c1536 = arith.constant 1536 : index
    %20 = vector.load %arg4[%c0_14, %c1536] : memref<128x3072xbf16, #tpu.memory_space<vmem>>, vector<128x768xbf16>
    %21 = arith.truncf %11 : vector<2x768xf32> to vector<2x768xbf16>
    %cst_15 = arith.constant dense<0.000000e+00> : vector<2x128xf32>
    %22 = tpu.matmul %21, %20, %cst_15 {dimension_numbers = #tpu.dot_dimension_numbers<[1], [1], [0], [0], [0, 0, 1, 0], [], []>} : vector<2x768xbf16>, vector<128x768xbf16>, vector<2x128xf32> -> vector<2x128xf32>
    %23 = arith.addf %19, %22 : vector<2x128xf32>
    %c0_16 = arith.constant 0 : index
    %c2304 = arith.constant 2304 : index
    %24 = vector.load %arg4[%c0_16, %c2304] : memref<128x3072xbf16, #tpu.memory_space<vmem>>, vector<128x768xbf16>
    %25 = arith.truncf %12 : vector<2x768xf32> to vector<2x768xbf16>
    %cst_17 = arith.constant dense<0.000000e+00> : vector<2x128xf32>
    %26 = tpu.matmul %25, %24, %cst_17 {dimension_numbers = #tpu.dot_dimension_numbers<[1], [1], [0], [0], [0, 0, 1, 0], [], []>} : vector<2x768xbf16>, vector<128x768xbf16>, vector<2x128xf32> -> vector<2x128xf32>
    %27 = arith.addf %23, %26 : vector<2x128xf32>
    %c0_18 = arith.constant 0 : index
    %c0_19 = arith.constant 0 : index
    %28 = vector.load %arg5[%c0_18, %c0_19] : memref<1x128xf32, #tpu.memory_space<vmem>>, vector<1x128xf32>
    %29 = vector.broadcast %28 : vector<1x128xf32> to vector<2x128xf32>
    %30 = arith.addf %27, %29 : vector<2x128xf32>
    %c0_20 = arith.constant 0 : index
    %c0_21 = arith.constant 0 : index
    %31 = vector.load %arg6[%c0_20, %c0_21] : memref<2x128xf32, #tpu.memory_space<vmem>>, vector<2x128xf32>
    tpu.vector_store %arg6[%c0_20, %c0_21], %30 {strides = array<i32>} : memref<2x128xf32, #tpu.memory_space<vmem>>, vector<2x128xf32>,
    return
  }
}

</mosaic_0001>

<bundles_post_ra>
// kernel: tpu_custom_call.1
= control target key start
LH: loop header
LB: loop body
LE: loop exit
PB: predicated region body
PF: predicated region fallthrough
CT: control target
= control target key end

     0   :  { %11 = vsyncpa [#allocation3], 0  ;;  %s5856_s0 = inlined_call_operand.hbm [shape: bf16[2,768], index: 0, kind: input, shape index: {}]   ;;  %s5857_s1 = inlined_call_operand.hbm [shape: bf16[2,8,768], index: 1, kind: input, shape index: {}]   ;;  %s5858_s2 = inlined_call_operand.hbm [shape: bf16[768,768], index: 2, kind: input, shape index: {}]   ;;  %s5859_s3 = inlined_call_operand.hbm [shape: f32[1,768], index: 3, kind: input, shape index: {}]   ;;  %s5860_s4 = inlined_call_operand.hbm [shape: bf16[128,3072], index: 4, kind: input, shape index: {}]   ;;  %s5861_s5 = inlined_call_operand.hbm [shape: f32[1,128], index: 5, kind: input, shape index: {}]   ;;  %s5862_s6 = inlined_call_operand.hbm [shape: f32[2,128], index: 6, kind: output, shape index: {}]  }
   0x1   :  { %12 = vsyncpa [#allocation6], 0 }
   0x2   :  { %13 = vsyncpa [#allocation9], 0 }
   0x3   :  { %14 = vsyncpa [#allocation12], 0 }
   0x4   :  { %15 = vsyncpa [#allocation4], 0  ;;  %s5415_s21 = smov [#allocation5]   ;;  %s5251_s25 = scalar_lea.hbm %s5857_s1, 768 }
   0x5   :  { %s31_s22 = sshll.u32 %s5415_s21, 4  ;;  %p5252_p0 = scmp.ne.s32.totalorder %s5857_s1, %s5251_s25  ;;  %s32_s22 = int_to_ptr.vmem [resolvable:$true] %s31_s22 }
   0x6   :  { %p5255_p1 = scmp.lt.u32.totalorder %s5251_s25, %s5857_s1 }
   0x8   :  { %p5257_p2 = pnand %p5255_p1, %p5252_p0 }
   0xa   :  { %5260 = shalt.err (!%p5257_p2)
}
   0xb   :  { %s5261_s30 = scalar_lea.vmem %s32_s22, 768  ;;  %p5266_p4 = scmp.lt.s32.totalorder %s32_s22, %s32_s22 }
   0xc   :  { %p5262_p3 = scmp.ne.s32.totalorder %s32_s22, %s5261_s30  ;;  %p5267_p5 = scmp.lt.s32.totalorder %s5261_s30, %s5261_s30 }
   0xe   :  { %p5268_p6 = por %p5267_p5, %p5266_p4 }
  0x10   :  { %p5269_p7 = pnand %p5268_p6, %p5262_p3 }
  0x12   :  { %5272 = shalt.err (!%p5269_p7)
}
  0x13   :  { %s5416_s7 = smov 384   ;;  %s5417_s8 = smov 24  }
  0x14   :  { %37 = dma.hbm_to_vmem [thread:$0]  %s5857_s1, 768, %s32_s22, [#allocation6], %s5416_s7, %s5416_s7, %s5417_s8  }
  0x15   :  { %s5418_s11 = smov [#allocation8]   ;;  %s5419_s13 = smov [#allocation2]  }
  0x16   :  { %s56_s12 = sshll.u32 %s5418_s11, 4  ;;  %s22_s14 = sshll.u32 %s5419_s13, 4  ;;  %s57_s12 = int_to_ptr.vmem [resolvable:$true] %s56_s12  ;;  %s23_s14 = int_to_ptr.vmem [resolvable:$true] %s22_s14 }
  0x17   :  { %s5273_s17 = scalar_lea.hbm %s5859_s3, 96 }
  0x18   :  { %p5274_p8 = scmp.ne.s32.totalorder %s5859_s3, %s5273_s17  ;;  %p5277_p9 = scmp.lt.u32.totalorder %s5273_s17, %s5859_s3 }
  0x1a   :  { %p5279_p10 = pnand %p5277_p9, %p5274_p8 }
  0x1c   :  { %5282 = shalt.err (!%p5279_p10)
}
  0x1d   :  { %s5283_s1 = scalar_lea.vmem %s57_s12, 96  ;;  %p5288_p12 = scmp.lt.s32.totalorder %s57_s12, %s57_s12 }
  0x1e   :  { %p5284_p11 = scmp.ne.s32.totalorder %s57_s12, %s5283_s1  ;;  %p5289_p13 = scmp.lt.s32.totalorder %s5283_s1, %s5283_s1 }
  0x20   :  { %p5290_p0 = por %p5289_p13, %p5288_p12 }
  0x22   :  { %p5291_p1 = pnand %p5290_p0, %p5284_p11 }
  0x24   :  { %5294 = shalt.err (!%p5291_p1)
}
  0x25   :  { %59 = dma.hbm_to_vmem [thread:$0]  %s5859_s3, 96, %s57_s12, [#allocation9]  }
  0x26   :  { %s5295_s26 = scalar_lea.hbm %s5856_s0, 96 }
  0x27   :  { %p5296_p2 = scmp.ne.s32.totalorder %s5856_s0, %s5295_s26  ;;  %p5299_p3 = scmp.lt.u32.totalorder %s5295_s26, %s5856_s0 }
  0x29   :  { %p5301_p4 = pnand %p5299_p3, %p5296_p2 }
  0x2b   :  { %5304 = shalt.err (!%p5301_p4)
}
  0x2c   :  { %s5305_s9 = scalar_lea.vmem %s23_s14, 96  ;;  %p5310_p6 = scmp.lt.s32.totalorder %s23_s14, %s23_s14 }
  0x2d   :  { %p5306_p5 = scmp.ne.s32.totalorder %s23_s14, %s5305_s9  ;;  %p5311_p7 = scmp.lt.s32.totalorder %s5305_s9, %s5305_s9 }
  0x2f   :  { %p5312_p8 = por %p5311_p7, %p5310_p6 }
  0x31   :  { %p5313_p9 = pnand %p5312_p8, %p5306_p5 }
  0x33   :  { %5316 = shalt.err (!%p5313_p9)
}
  0x34   :  { %25 = dma.hbm_to_vmem [thread:$0]  %s5856_s0, 96, %s23_s14, [#allocation3]  }
  0x35   :  { %s5420_s11 = smov [#allocation7]   ;;  %s5421_s13 = smov [#allocation10]  }
  0x36   :  { %s43_s12 = sshll.u32 %s5420_s11, 4  ;;  %s65_s15 = sshll.u32 %s5421_s13, 4  ;;  %s44_s12 = int_to_ptr.vmem [resolvable:$true] %s43_s12  ;;  %s66_s15 = int_to_ptr.vmem [resolvable:$true] %s65_s15 }
  0x37   :  { %s5317_s18 = scalar_lea.hbm %s5858_s2, 36864 }
  0x38   :  { %p5318_p10 = scmp.ne.s32.totalorder %s5858_s2, %s5317_s18  ;;  %p5321_p11 = scmp.lt.u32.totalorder %s5317_s18, %s5858_s2 }
  0x3a   :  { %p5323_p12 = pnand %p5321_p11, %p5318_p10 }
  0x3c   :  { %5326 = shalt.err (!%p5323_p12)
}
  0x3d   :  { %s5327_s0 = scalar_lea.vmem %s44_s12, 36864  ;;  %p5332_p0 = scmp.lt.s32.totalorder %s44_s12, %s44_s12 }
  0x3e   :  { %p5328_p13 = scmp.ne.s32.totalorder %s44_s12, %s5327_s0  ;;  %p5333_p1 = scmp.lt.s32.totalorder %s5327_s0, %s5327_s0 }
  0x40   :  { %p5334_p2 = por %p5333_p1, %p5332_p0 }
  0x42   :  { %p5335_p3 = pnand %p5334_p2, %p5328_p13 }
  0x44   :  { %5338 = shalt.err (!%p5335_p3)
}
  0x45   :  { %49 = dma.hbm_to_vmem [thread:$0]  %s5858_s2, 36864, %s44_s12, [#allocation6], %s5416_s7, %s5416_s7, %s5417_s8  }
  0x46   :  { %s5339_s25 = scalar_lea.hbm %s5860_s4, 24576 }
  0x47   :  { %p5340_p4 = scmp.ne.s32.totalorder %s5860_s4, %s5339_s25  ;;  %p5343_p5 = scmp.lt.u32.totalorder %s5339_s25, %s5860_s4 }
  0x49   :  { %p5345_p6 = pnand %p5343_p5, %p5340_p4 }
  0x4b   :  { %5348 = shalt.err (!%p5345_p6)
}
  0x4c   :  { %s5349_s30 = scalar_lea.vmem %s66_s15, 24576  ;;  %p5354_p8 = scmp.lt.s32.totalorder %s66_s15, %s66_s15 }
  0x4d   :  { %p5350_p7 = scmp.ne.s32.totalorder %s66_s15, %s5349_s30  ;;  %p5355_p9 = scmp.lt.s32.totalorder %s5349_s30, %s5349_s30 }
  0x4f   :  { %p5356_p10 = por %p5355_p9, %p5354_p8 }
  0x51   :  { %p5357_p11 = pnand %p5356_p10, %p5350_p7 }
  0x53   :  { %5360 = shalt.err (!%p5357_p11)
}
  0x54   :  { %s5422_s2 = smov 1536   ;;  %s5423_s7 = smov 96  }
  0x55   :  { %71 = dma.hbm_to_vmem [thread:$0]  %s5860_s4, 24576, %s66_s15, [#allocation9], %s5422_s2, %s5422_s2, %s5423_s7  }
  0x56   :  { %s5424_s3 = smov [#allocation11]   ;;  %s5361_s13 = scalar_lea.hbm %s5861_s5, 16 }
  0x57   :  { %s78_s10 = sshll.u32 %s5424_s3, 4  ;;  %p5362_p12 = scmp.ne.s32.totalorder %s5861_s5, %s5361_s13  ;;  %s79_s10 = int_to_ptr.vmem [resolvable:$true] %s78_s10 }
  0x58   :  { %p5365_p13 = scmp.lt.u32.totalorder %s5361_s13, %s5861_s5 }
  0x5a   :  { %p5367_p0 = pnand %p5365_p13, %p5362_p12 }
  0x5c   :  { %5370 = shalt.err (!%p5367_p0)
}
  0x5d   :  { %s5371_s20 = scalar_lea.vmem %s79_s10, 16  ;;  %s5375_s4 = scalar_lea.vmem %s79_s10, 32 }
  0x5e   :  { %p5372_p1 = scmp.ne.s32.totalorder %s79_s10, %s5371_s20  ;;  %p5376_p2 = scmp.lt.s32.totalorder %s79_s10, %s79_s10 }
  0x5f   :  { %p5377_p3 = scmp.lt.s32.totalorder %s5375_s4, %s5371_s20 }
  0x61   :  { %p5378_p4 = por %p5377_p3, %p5376_p2 }
  0x63   :  { %p5379_p5 = pnand %p5378_p4, %p5372_p1 }
  0x65   :  { %5382 = shalt.err (!%p5379_p5)
}
  0x66   :  { %81 = dma.hbm_to_vmem [thread:$0]  %s5861_s5, 16, %s79_s10, [#allocation12]  }
  0x67   :  { %5405 = dma.done.wait [#allocation3], 96  }
  0x68   :  { %5406 = vsyncadd [#allocation3], 4294967200 }
  0x69   :  { %5407 = dma.done.wait [#allocation6], 37632  }
  0x6a   :  { %5408 = vsyncadd [#allocation6], 4294929664 }
  0x6b   :  { %5409 = dma.done.wait [#allocation9], 24672  }
  0x6c   :  { %5410 = vsyncadd [#allocation9], 4294942624 }
  0x6d   :  { %5411 = dma.done.wait [#allocation12], 16  }
  0x6e   :  { %5412 = vsyncadd [#allocation12], 4294967280  ;;  %v4806_v0 = vld [vmem:[#allocation7 + $0x4] ss:$24 sps:$4 sm:$0xff]   ;;  %v4810_v2 = vld [vmem:[#allocation7] ss:$24 sps:$4 sm:$0xff]   ;;  %v392_v36 = vlaneseq }
  0x6f   :  { %v4808_v1 = vld [vmem:[#allocation7 + $0xc] ss:$24 sps:$4 sm:$0xff]   ;;  %1916 = vmatprep.subr.bf16.mxu0 %v4806_v0  ;;  %v4811_v3 = vld [vmem:[#allocation7 + $0x8] ss:$24 sps:$4 sm:$0xff]   ;;  %v4814_v5 = vld [vmem:[#allocation7 + $0x3c] ss:$24 sps:$4 sm:$0xff]  }
  0x70   :  { %2039 = vmatprep.subr.bf16.mxu1 %v4808_v1  ;;  %v4812_v4 = vld [vmem:[#allocation7 + $0x34] ss:$24 sps:$4 sm:$0xff]   ;;  %1917 = vmatpush1.bf16.msra.mxu0 %v4810_v2  ;;  %v4816_v6 = vld [vmem:[#allocation7 + $0x30] ss:$24 sps:$4 sm:$0xff]   ;;  %v4818_v8 = vld [vmem:[#allocation7 + $0x64] ss:$24 sps:$4 sm:$0xff]  }
  0x71   :  { %2040 = vmatpush1.bf16.msra.mxu1 %v4811_v3  ;;  %1918 = vmatprep.subr.bf16.mxu0 %v4812_v4  ;;  %v4817_v7 = vld [vmem:[#allocation7 + $0x38] ss:$24 sps:$4 sm:$0xff]   ;;  %v4820_v9 = vld [vmem:[#allocation7 + $0x6c] ss:$24 sps:$4 sm:$0xff]   ;;  %v4823_v11 = vld [vmem:[#allocation7 + $0x68] ss:$24 sps:$4 sm:$0xff]  }
  0x72   :  { %2041 = vmatprep.subr.bf16.mxu1 %v4814_v5  ;;  %v4822_v10 = vld [vmem:[#allocation7 + $0x60] ss:$24 sps:$4 sm:$0xff]   ;;  %v4824_v12 = vld [vmem:[#allocation7 + $0x94] ss:$24 sps:$4 sm:$0xff]   ;;  %v4828_v14 = vld [vmem:[#allocation7 + $0x90] ss:$24 sps:$4 sm:$0xff]  }
  0x73   :  { %v4826_v13 = vld [vmem:[#allocation7 + $0x9c] ss:$24 sps:$4 sm:$0xff]   ;;  %v4829_v15 = vld [vmem:[#allocation7 + $0x98] ss:$24 sps:$4 sm:$0xff]   ;;  %v4832_v17 = vld [vmem:[#allocation7 + $0xcc] ss:$24 sps:$4 sm:$0xff]  }
  0x74   :  { %1919 = vmatpush1.bf16.msra.mxu0 %v4816_v6  ;;  %v4830_v16 = vld [vmem:[#allocation7 + $0xc4] ss:$24 sps:$4 sm:$0xff]   ;;  %v4834_v18 = vld [vmem:[#allocation7 + $0xc0] ss:$24 sps:$4 sm:$0xff]   ;;  %v4836_v20 = vld [vmem:[#allocation7 + $0xf4] ss:$24 sps:$4 sm:$0xff]  }
  0x75   :  { %2042 = vmatpush1.bf16.msra.mxu1 %v4817_v7  ;;  %1920 = vmatprep.subr.bf16.mxu0 %v4818_v8  ;;  %v4835_v19 = vld [vmem:[#allocation7 + $0xc8] ss:$24 sps:$4 sm:$0xff]   ;;  %v4838_v21 = vld [vmem:[#allocation7 + $0xfc] ss:$24 sps:$4 sm:$0xff]   ;;  %v4841_v23 = vld [vmem:[#allocation7 + $0xf8] ss:$24 sps:$4 sm:$0xff]  }
  0x76   :  { %2043 = vmatprep.subr.bf16.mxu1 %v4820_v9  ;;  %v4840_v22 = vld [vmem:[#allocation7 + $0xf0] ss:$24 sps:$4 sm:$0xff]   ;;  %v4842_v24 = vld [vmem:[#allocation7 + $0x124] ss:$24 sps:$4 sm:$0xff]   ;;  %v4846_v26 = vld [vmem:[#allocation7 + $0x120] ss:$24 sps:$4 sm:$0xff]  }
  0x77   :  { %v4844_v25 = vld [vmem:[#allocation7 + $0x12c] ss:$24 sps:$4 sm:$0xff]   ;;  %v4847_v27 = vld [vmem:[#allocation7 + $0x128] ss:$24 sps:$4 sm:$0xff]   ;;  %v4850_v29 = vld [vmem:[#allocation7 + $0x15c] ss:$24 sps:$4 sm:$0xff]  }
  0x78   :  { %1921 = vmatpush1.bf16.msra.mxu0 %v4822_v10  ;;  %v4848_v28 = vld [vmem:[#allocation7 + $0x154] ss:$24 sps:$4 sm:$0xff]   ;;  %v4852_v30 = vld [vmem:[#allocation7 + $0x150] ss:$24 sps:$4 sm:$0xff]   ;;  %v4854_v32 = vld [vmem:[#allocation7 + $0x184] ss:$24 sps:$4 sm:$0xff]  }
  0x79   :  { %2044 = vmatpush1.bf16.msra.mxu1 %v4823_v11  ;;  %1922 = vmatprep.subr.bf16.mxu0 %v4824_v12  ;;  %v4853_v31 = vld [vmem:[#allocation7 + $0x158] ss:$24 sps:$4 sm:$0xff]   ;;  %v4856_v33 = vld [vmem:[#allocation7 + $0x18c] ss:$24 sps:$4 sm:$0xff]   ;;  %v4859_v35 = vld [vmem:[#allocation7 + $0x188] ss:$24 sps:$4 sm:$0xff]  }
  0x7a   :  { %2045 = vmatprep.subr.bf16.mxu1 %v4826_v13  ;;  %v4858_v34 = vld [vmem:[#allocation7 + $0x180] ss:$24 sps:$4 sm:$0xff]   ;;  %v5425_v37 = vmov 1966171168   ;;  %v4860_v39 = vld [vmem:[#allocation7 + $0x1b4] ss:$24 sps:$4 sm:$0xff]  }
  0x7b   :  { %v425_v38 = vunpack.c.l.s4 %v5425_v37  ;;  %v4862_v40 = vld [vmem:[#allocation7 + $0x1bc] ss:$24 sps:$4 sm:$0xff]   ;;  %v4864_v41 = vld [vmem:[#allocation7 + $0x1b0] ss:$24 sps:$4 sm:$0xff]   ;;  %v5540_v42 = vshrl.u32 %v392_v36, 7  ;;  %vm2939_vm0 = vcmask 1041409  }
  0x7c   :  { %1923 = vmatpush1.bf16.msra.mxu0 %v4828_v14  ;;  %v4865_v44 = vld [vmem:[#allocation7 + $0x1b8] ss:$24 sps:$4 sm:$0xff]   ;;  %v4866_v45 = vld [vmem:[#allocation7 + $0x1e4] ss:$24 sps:$4 sm:$0xff]   ;;  %v4871_v48 = vld [vmem:[#allocation7 + $0x1e8] ss:$24 sps:$4 sm:$0xff]  }
  0x7d   :  { %2046 = vmatpush1.bf16.msra.mxu1 %v4829_v15  ;;  %1924 = vmatprep.subr.bf16.mxu0 %v4830_v16  ;;  %v426_v43 = vunpack.c.0.s8 %v425_v38  ;;  %v4868_v46 = vld [vmem:[#allocation7 + $0x1ec] ss:$24 sps:$4 sm:$0xff]   ;;  %v4870_v47 = vld [vmem:[#allocation7 + $0x1e0] ss:$24 sps:$4 sm:$0xff]   ;;  %v4874_v51 = vld [vmem:[#allocation7 + $0x21c] ss:$24 sps:$4 sm:$0xff]  }
  0x7e   :  { %2047 = vmatprep.subr.bf16.mxu1 %v4832_v17  ;;  %v4872_v50 = vld [vmem:[#allocation7 + $0x214] ss:$24 sps:$4 sm:$0xff]   ;;  %v4876_v53 = vld [vmem:[#allocation7 + $0x210] ss:$24 sps:$4 sm:$0xff]   ;;  %v4878_v56 = vld [vmem:[#allocation7 + $0x244] ss:$24 sps:$4 sm:$0xff]  }
  0x7f   :  { %v429_v49 = vsub.s32 %v426_v43, %v5540_v42  ;;  %v101_v52 = vld [vmem:[#allocation2] sm:$0x3f]  ;;  %v4877_v55 = vld [vmem:[#allocation7 + $0x218] ss:$24 sps:$4 sm:$0xff]   ;;  %v4886_v63 = vld [vmem:[#allocation7 + $0x27c] ss:$24 sps:$4 sm:$0xff]  }
  0x80   :  { %1925 = vmatpush1.bf16.msra.mxu0 %v4834_v18  ;;  %v4880_v57 = vld [vmem:[#allocation7 + $0x24c] ss:$24 sps:$4 sm:$0xff]   ;;  %v4882_v59 = vld [vmem:[#allocation7 + $0x240] ss:$24 sps:$4 sm:$0xff]   ;;  %v4888_v0 = vld [vmem:[#allocation7 + $0x270] ss:$24 sps:$4 sm:$0xff]   ;;  %v423_v8 = vcombine.high %v101_v52, %v101_v52 }
  0x81   :  { %2048 = vmatpush1.bf16.msra.mxu1 %v4835_v19  ;;  %1926 = vmatprep.subr.bf16.mxu0 %v4836_v20  ;;  %v430_v54 = vrot.slane %v101_v52, %v429_v49  ;;  %v4883_v61 = vld [vmem:[#allocation7 + $0x248] ss:$24 sps:$4 sm:$0xff]   ;;  %v4884_v62 = vld [vmem:[#allocation7 + $0x274] ss:$24 sps:$4 sm:$0xff]   ;;  %v4889_v1 = vld [vmem:[#allocation7 + $0x278] ss:$24 sps:$4 sm:$0xff]  }
  0x82   :  { %2049 = vmatprep.subr.bf16.mxu1 %v4838_v21  ;;  %v4890_v2 = vld [vmem:[#allocation7 + $0x2a4] ss:$24 sps:$4 sm:$0xff]   ;;  %v4894_v4 = vld [vmem:[#allocation7 + $0x2a0] ss:$24 sps:$4 sm:$0xff]   ;;  %v4896_v6 = vld [vmem:[#allocation7 + $0x2d4] ss:$24 sps:$4 sm:$0xff]   ;;  %v437_v11 = vrot.slane %v423_v8, %v429_v49 }
  0x83   :  { %v438_v58 = vcombine.high %v430_v54, %v430_v54  ;;  %v4892_v3 = vld [vmem:[#allocation7 + $0x2ac] ss:$24 sps:$4 sm:$0xff]   ;;  %v4895_v5 = vld [vmem:[#allocation7 + $0x2a8] ss:$24 sps:$4 sm:$0xff]   ;;  %v4898_v7 = vld [vmem:[#allocation7 + $0x2dc] ss:$24 sps:$4 sm:$0xff]   ;;  %v5547_v16 = vrot.slane %v430_v54, %v429_v49 }
  0x84   :  { %1927 = vmatpush1.bf16.msra.mxu0 %v4840_v22  ;;  %v4900_v9 = vld [vmem:[#allocation7 + $0x2d0] ss:$24 sps:$4 sm:$0xff]   ;;  %v4904_v12 = vld [vmem:[#allocation7 + $0x304] ss:$24 sps:$4 sm:$0xff]   ;;  %v439_v14 = vcombine.high %v437_v11, %v437_v11  ;;  %v4902_v15 = vld [vmem:[#allocation7 + $0x300] ss:$24 sps:$4 sm:$0xff]   ;;  %v5551_v19 = vrot.slane %v437_v11, %v429_v49 }
  0x85   :  { %2050 = vmatpush1.bf16.msra.mxu1 %v4841_v23  ;;  %1928 = vmatprep.subr.bf16.mxu0 %v4842_v24  ;;  %v5543_v60 = vrot.slane %v438_v58, %v429_v49  ;;  %v4901_v10 = vld [vmem:[#allocation7 + $0x2d8] ss:$24 sps:$4 sm:$0xff]   ;;  %v4907_v13 = vld [vmem:[#allocation7 + $0x30c] ss:$24 sps:$4 sm:$0xff]   ;;  %v4905_v17 = vld [vmem:[#allocation7 + $0x308] ss:$24 sps:$4 sm:$0xff]  }
  0x86   :  { %2051 = vmatprep.subr.bf16.mxu1 %v4844_v25  ;;  %v5549_v18 = vrot.slane %v439_v14, %v429_v49  ;;  %v4910_v20 = vld [vmem:[#allocation7 + $0x334] ss:$24 sps:$4 sm:$0xff]   ;;  %v4908_v23 = vld [vmem:[#allocation7 + $0x330] ss:$24 sps:$4 sm:$0xff]   ;;  %v4916_v25 = vld [vmem:[#allocation7 + $0x364] ss:$24 sps:$4 sm:$0xff]  }
  0x87   :  { %1948 = vmatprep.mubr.bf16.mxu0 %v5543_v60  ;;  %2071 = vmatprep.mubr.bf16.mxu1 %v5543_v60  ;;  %v4913_v21 = vld [vmem:[#allocation7 + $0x33c] ss:$24 sps:$4 sm:$0xff]   ;;  %v5555_v22 = vcombine.high %v5543_v60, %v5543_v60  ;;  %v4911_v24 = vld [vmem:[#allocation7 + $0x338] ss:$24 sps:$4 sm:$0xff]   ;;  %v4929_v36 = vld [vmem:[#allocation7 + $0x3c8] ss:$24 sps:$4 sm:$0xff]  }
  0x88   :  { %1929 = vmatpush1.bf16.msra.mxu0 %v4846_v26  ;;  %v4919_v26 = vld [vmem:[#allocation7 + $0x36c] ss:$24 sps:$4 sm:$0xff]   ;;  %v4937_v38 = vld [vmem:[#allocation7 + $0x3fc] ss:$24 sps:$4 sm:$0xff]   ;;  %v4947_v49 = vld [vmem:[#allocation7 + $0x458] ss:$24 sps:$4 sm:$0xff]  }
  0x89   :  { %2052 = vmatpush1.bf16.msra.mxu1 %v4847_v27  ;;  %1930 = vmatprep.subr.bf16.mxu0 %v4848_v28  ;;  %v4914_v27 = vld [vmem:[#allocation7 + $0x360] ss:$24 sps:$4 sm:$0xff]   ;;  %v4934_v37 = vld [vmem:[#allocation7 + $0x3f4] ss:$24 sps:$4 sm:$0xff]   ;;  %v4964_v58 = vld [vmem:[#allocation7 + $0x4e4] ss:$24 sps:$4 sm:$0xff]  }
  0x8a   :  { %2053 = vmatprep.subr.bf16.mxu1 %v4850_v29  ;;  %v4917_v28 = vld [vmem:[#allocation7 + $0x368] ss:$24 sps:$4 sm:$0xff]   ;;  %v4922_v29 = vld [vmem:[#allocation7 + $0x394] ss:$24 sps:$4 sm:$0xff]   ;;  %v4988_v11 = vld [vmem:[#allocation7 + $0x5a4] ss:$24 sps:$4 sm:$0xff]  }
  0x8b   :  { %v4943_v43 = vld [vmem:[#allocation7 + $0x42c] ss:$24 sps:$4 sm:$0xff]   ;;  %v4950_v52 = vld [vmem:[#allocation7 + $0x480] ss:$24 sps:$4 sm:$0xff]   ;;  %v4985_v8 = vld [vmem:[#allocation7 + $0x57c] ss:$24 sps:$4 sm:$0xff]  }
  0x8c   :  { %1931 = vmatpush1.bf16.msra.mxu0 %v4852_v30  ;;  %v4925_v30 = vld [vmem:[#allocation7 + $0x39c] ss:$24 sps:$4 sm:$0xff]   ;;  %v4989_v14 = vld [vmem:[#allocation7 + $0x5a8] ss:$24 sps:$4 sm:$0xff]   ;;  %s5426_s5 = smov [#allocation13]  }
  0x8d   :  { %2054 = vmatpush1.bf16.msra.mxu1 %v4853_v31  ;;  %1932 = vmatprep.subr.bf16.mxu0 %v4854_v32  ;;  %v4920_v31 = vld [vmem:[#allocation7 + $0x390] ss:$24 sps:$4 sm:$0xff]   ;;  %v4958_v54 = vld [vmem:[#allocation7 + $0x4b4] ss:$24 sps:$4 sm:$0xff]   ;;  %s4271_s1 = sshll.u32 %s5426_s5, 4  ;;  %s4272_s1 = int_to_ptr.vmem [resolvable:$true] %s4271_s1 }
  0x8e   :  { %2055 = vmatprep.subr.bf16.mxu1 %v4856_v33  ;;  %v4923_v32 = vld [vmem:[#allocation7 + $0x398] ss:$24 sps:$4 sm:$0xff]   ;;  %v4928_v33 = vld [vmem:[#allocation7 + $0x3c4] ss:$24 sps:$4 sm:$0xff]   ;;  %s5383_s0 = scalar_lea.vmem %s4272_s1, 32  ;;  %p5388_p7 = scmp.lt.s32.totalorder %s4272_s1, %s4272_s1 }
  0x8f   :  { %p5384_p6 = scmp.ne.s32.totalorder %s4272_s1, %s5383_s0  ;;  %p5389_p8 = scmp.lt.s32.totalorder %s5383_s0, %s5383_s0 }
  0x90   :  { %1933 = vmatpush1.bf16.msra.mxu0 %v4858_v34  ;;  %v4931_v34 = vld [vmem:[#allocation7 + $0x3cc] ss:$24 sps:$4 sm:$0xff]  }
  0x91   :  { %2056 = vmatpush1.bf16.msra.mxu1 %v4859_v35  ;;  %1934 = vmatprep.subr.bf16.mxu0 %v4860_v39  ;;  %v4926_v35 = vld [vmem:[#allocation7 + $0x3c0] ss:$24 sps:$4 sm:$0xff]   ;;  %v4932_v39 = vld [vmem:[#allocation7 + $0x3f0] ss:$24 sps:$4 sm:$0xff]   ;;  %p5390_p9 = por %p5389_p8, %p5388_p7 }
  0x92   :  { %2057 = vmatprep.subr.bf16.mxu1 %v4862_v40  ;;  %v4935_v40 = vld [vmem:[#allocation7 + $0x3f8] ss:$24 sps:$4 sm:$0xff]  }
  0x93   :  { %p5391_p10 = pnand %p5390_p9, %p5384_p6 }
  0x94   :  { %1935 = vmatpush1.bf16.msra.mxu0 %v4864_v41  ;;  %v4940_v41 = vld [vmem:[#allocation7 + $0x424] ss:$24 sps:$4 sm:$0xff]  }
  0x95   :  { %2058 = vmatpush1.bf16.msra.mxu1 %v4865_v44  ;;  %1936 = vmatprep.subr.bf16.mxu0 %v4866_v45  ;;  %v4938_v44 = vld [vmem:[#allocation7 + $0x420] ss:$24 sps:$4 sm:$0xff]  }
  0x96   :  { %2059 = vmatprep.subr.bf16.mxu1 %v4868_v46  ;;  %v4941_v45 = vld [vmem:[#allocation7 + $0x428] ss:$24 sps:$4 sm:$0xff]   ;;  %v4946_v46 = vld [vmem:[#allocation7 + $0x454] ss:$24 sps:$4 sm:$0xff]  }
  0x98   :  { %1937 = vmatpush1.bf16.msra.mxu0 %v4870_v47  ;;  %v4949_v47 = vld [vmem:[#allocation7 + $0x45c] ss:$24 sps:$4 sm:$0xff]  }
  0x99   :  { %2060 = vmatpush1.bf16.msra.mxu1 %v4871_v48  ;;  %1938 = vmatprep.subr.bf16.mxu0 %v4872_v50  ;;  %v4944_v48 = vld [vmem:[#allocation7 + $0x450] ss:$24 sps:$4 sm:$0xff]   ;;  %v4952_v50 = vld [vmem:[#allocation7 + $0x484] ss:$24 sps:$4 sm:$0xff]  }
  0x9a   :  { %2061 = vmatprep.subr.bf16.mxu1 %v4874_v51  ;;  %v4955_v51 = vld [vmem:[#allocation7 + $0x48c] ss:$24 sps:$4 sm:$0xff]  }
  0x9c   :  { %1939 = vmatpush1.bf16.msra.mxu0 %v4876_v53  ;;  %v4953_v53 = vld [vmem:[#allocation7 + $0x488] ss:$24 sps:$4 sm:$0xff]  }
  0x9d   :  { %2062 = vmatpush1.bf16.msra.mxu1 %v4877_v55  ;;  %1940 = vmatprep.subr.bf16.mxu0 %v4878_v56  ;;  %v4961_v55 = vld [vmem:[#allocation7 + $0x4bc] ss:$24 sps:$4 sm:$0xff]   ;;  %v4956_v56 = vld [vmem:[#allocation7 + $0x4b0] ss:$24 sps:$4 sm:$0xff]  }
  0x9e   :  { %2063 = vmatprep.subr.bf16.mxu1 %v4880_v57  ;;  %v4959_v57 = vld [vmem:[#allocation7 + $0x4b8] ss:$24 sps:$4 sm:$0xff]  }
  0xa0   :  { %1941 = vmatpush1.bf16.msra.mxu0 %v4882_v59  ;;  %v4967_v59 = vld [vmem:[#allocation7 + $0x4ec] ss:$24 sps:$4 sm:$0xff]  }
  0xa1   :  { %2064 = vmatpush1.bf16.msra.mxu1 %v4883_v61  ;;  %1942 = vmatprep.subr.bf16.mxu0 %v4884_v62  ;;  %v4962_v61 = vld [vmem:[#allocation7 + $0x4e0] ss:$24 sps:$4 sm:$0xff]  }
  0xa2   :  { %2065 = vmatprep.subr.bf16.mxu1 %v4886_v63  ;;  %v4965_v62 = vld [vmem:[#allocation7 + $0x4e8] ss:$24 sps:$4 sm:$0xff]   ;;  %v4970_v63 = vld [vmem:[#allocation7 + $0x514] ss:$24 sps:$4 sm:$0xff]  }
  0xa4   :  { %1943 = vmatpush1.bf16.msra.mxu0 %v4888_v0  ;;  %v4973_v0 = vld [vmem:[#allocation7 + $0x51c] ss:$24 sps:$4 sm:$0xff]  }
  0xa5   :  { %2066 = vmatpush1.bf16.msra.mxu1 %v4889_v1  ;;  %1944 = vmatprep.subr.bf16.mxu0 %v4890_v2  ;;  %v4968_v1 = vld [vmem:[#allocation7 + $0x510] ss:$24 sps:$4 sm:$0xff]  }
  0xa6   :  { %2067 = vmatprep.subr.bf16.mxu1 %v4892_v3  ;;  %v4971_v2 = vld [vmem:[#allocation7 + $0x518] ss:$24 sps:$4 sm:$0xff]   ;;  %v4976_v3 = vld [vmem:[#allocation7 + $0x544] ss:$24 sps:$4 sm:$0xff]  }
  0xa8   :  { %1945 = vmatpush1.bf16.msra.mxu0 %v4894_v4  ;;  %v4979_v4 = vld [vmem:[#allocation7 + $0x54c] ss:$24 sps:$4 sm:$0xff]  }
  0xa9   :  { %2068 = vmatpush1.bf16.msra.mxu1 %v4895_v5  ;;  %1946 = vmatprep.subr.bf16.mxu0 %v4896_v6  ;;  %v4974_v5 = vld [vmem:[#allocation7 + $0x540] ss:$24 sps:$4 sm:$0xff]  }
  0xaa   :  { %2069 = vmatprep.subr.bf16.mxu1 %v4898_v7  ;;  %v4977_v6 = vld [vmem:[#allocation7 + $0x548] ss:$24 sps:$4 sm:$0xff]   ;;  %v4982_v7 = vld [vmem:[#allocation7 + $0x574] ss:$24 sps:$4 sm:$0xff]  }
  0xac   :  { %1947 = vmatpush1.bf16.msra.mxu0 %v4900_v9  ;;  %v4980_v9 = vld [vmem:[#allocation7 + $0x570] ss:$24 sps:$4 sm:$0xff]  }
  0xad   :  { %2070 = vmatpush1.bf16.msra.mxu1 %v4901_v10  ;;  %1957 = vmatprep.subr.bf16.mxu0 %v4904_v12  ;;  %v4983_v10 = vld [vmem:[#allocation7 + $0x578] ss:$24 sps:$4 sm:$0xff]   ;;  %v4991_v12 = vld [vmem:[#allocation7 + $0x5ac] ss:$24 sps:$4 sm:$0xff]  }
  0xae   :  { %2080 = vmatprep.subr.bf16.mxu1 %v4907_v13  ;;  %v4986_v13 = vld [vmem:[#allocation7 + $0x5a0] ss:$24 sps:$4 sm:$0xff]  }
  0xaf   :  { %1949 = vmatmul.mubr.bf16.vlgmr.msra.gmra.mrb[0].mxu0 %v5547_v16 }
  0xb0   :  { %2072 = vmatmul.mubr.bf16.vlgmr.msra.gmra.mrb[0].mxu1 %v5547_v16  ;;  %1958 = vmatpush1.bf16.msra.mxu0 %v4902_v15  ;;  %v4994_v15 = vld [vmem:[#allocation7 + $0x5d4] ss:$24 sps:$4 sm:$0xff]  }
  0xb1   :  { %2081 = vmatpush1.bf16.msra.mxu1 %v4905_v17  ;;  %1959 = vmatprep.subr.bf16.mxu0 %v4910_v20  ;;  %v4997_v17 = vld [vmem:[#allocation7 + $0x5dc] ss:$24 sps:$4 sm:$0xff]   ;;  %v4992_v20 = vld [vmem:[#allocation7 + $0x5d0] ss:$24 sps:$4 sm:$0xff]  }
  0xb2   :  { %2082 = vmatprep.subr.bf16.mxu1 %v4913_v21  ;;  %1989 = vmatprep.mubr.bf16.mxu0 %v5555_v22  ;;  %v4995_v21 = vld [vmem:[#allocation7 + $0x5d8] ss:$24 sps:$4 sm:$0xff]  }
  0xb3   :  { %2112 = vmatprep.mubr.bf16.mxu1 %v5555_v22 }
  0xb4   :  { %1960 = vmatpush1.bf16.msra.mxu0 %v4908_v23  ;;  %v5000_v23 = vld [vmem:[#allocation7 + $0x604] ss:$24 sps:$4 sm:$0xff]  }
  0xb5   :  { %2083 = vmatpush1.bf16.msra.mxu1 %v4911_v24  ;;  %1961 = vmatprep.subr.bf16.mxu0 %v4916_v25  ;;  %v5003_v24 = vld [vmem:[#allocation7 + $0x60c] ss:$24 sps:$4 sm:$0xff]   ;;  %v4998_v25 = vld [vmem:[#allocation7 + $0x600] ss:$24 sps:$4 sm:$0xff]  }
  0xb6   :  { %2084 = vmatprep.subr.bf16.mxu1 %v4919_v26  ;;  %v5563_v26 = vcombine.high %v5547_v16, %v5547_v16 }
  0xb8   :  { %1962 = vmatpush1.bf16.msra.mxu0 %v4914_v27  ;;  %v5001_v27 = vld [vmem:[#allocation7 + $0x608] ss:$24 sps:$4 sm:$0xff]  }
  0xb9   :  { %2085 = vmatpush1.bf16.msra.mxu1 %v4917_v28  ;;  %1963 = vmatprep.subr.bf16.mxu0 %v4922_v29  ;;  %v5006_v28 = vld [vmem:[#allocation7 + $0x634] ss:$24 sps:$4 sm:$0xff]  }
  0xba   :  { %2086 = vmatprep.subr.bf16.mxu1 %v4925_v30  ;;  %v5009_v29 = vld [vmem:[#allocation7 + $0x63c] ss:$24 sps:$4 sm:$0xff]   ;;  %v5004_v30 = vld [vmem:[#allocation7 + $0x630] ss:$24 sps:$4 sm:$0xff]  }
  0xbc   :  { %1964 = vmatpush1.bf16.msra.mxu0 %v4920_v31  ;;  %v5007_v31 = vld [vmem:[#allocation7 + $0x638] ss:$24 sps:$4 sm:$0xff]  }
  0xbd   :  { %2087 = vmatpush1.bf16.msra.mxu1 %v4923_v32  ;;  %1965 = vmatprep.subr.bf16.mxu0 %v4928_v33  ;;  %v5012_v32 = vld [vmem:[#allocation7 + $0x664] ss:$24 sps:$4 sm:$0xff]  }
  0xbe   :  { %2088 = vmatprep.subr.bf16.mxu1 %v4931_v34  ;;  %v5015_v33 = vld [vmem:[#allocation7 + $0x66c] ss:$24 sps:$4 sm:$0xff]   ;;  %v5010_v34 = vld [vmem:[#allocation7 + $0x660] ss:$24 sps:$4 sm:$0xff]  }
  0xc0   :  { %1966 = vmatpush1.bf16.msra.mxu0 %v4926_v35  ;;  %v5013_v35 = vld [vmem:[#allocation7 + $0x668] ss:$24 sps:$4 sm:$0xff]  }
  0xc1   :  { %2089 = vmatpush1.bf16.msra.mxu1 %v4929_v36  ;;  %1967 = vmatprep.subr.bf16.mxu0 %v4934_v37  ;;  %v5018_v36 = vld [vmem:[#allocation7 + $0x694] ss:$24 sps:$4 sm:$0xff]  }
  0xc2   :  { %2090 = vmatprep.subr.bf16.mxu1 %v4937_v38  ;;  %v5021_v37 = vld [vmem:[#allocation7 + $0x69c] ss:$24 sps:$4 sm:$0xff]   ;;  %v5016_v38 = vld [vmem:[#allocation7 + $0x690] ss:$24 sps:$4 sm:$0xff]  }
  0xc4   :  { %1968 = vmatpush1.bf16.msra.mxu0 %v4932_v39  ;;  %v5019_v39 = vld [vmem:[#allocation7 + $0x698] ss:$24 sps:$4 sm:$0xff]  }
  0xc5   :  { %2091 = vmatpush1.bf16.msra.mxu1 %v4935_v40  ;;  %1969 = vmatprep.subr.bf16.mxu0 %v4940_v41  ;;  %v5024_v40 = vld [vmem:[#allocation7 + $0x6c4] ss:$24 sps:$4 sm:$0xff]  }
  0xc6   :  { %2092 = vmatprep.subr.bf16.mxu1 %v4943_v43  ;;  %v5027_v41 = vld [vmem:[#allocation7 + $0x6cc] ss:$24 sps:$4 sm:$0xff]   ;;  %v5022_v43 = vld [vmem:[#allocation7 + $0x6c0] ss:$24 sps:$4 sm:$0xff]  }
  0xc8   :  { %1970 = vmatpush1.bf16.msra.mxu0 %v4938_v44  ;;  %v5025_v44 = vld [vmem:[#allocation7 + $0x6c8] ss:$24 sps:$4 sm:$0xff]  }
  0xc9   :  { %2093 = vmatpush1.bf16.msra.mxu1 %v4941_v45  ;;  %1971 = vmatprep.subr.bf16.mxu0 %v4946_v46  ;;  %v5030_v45 = vld [vmem:[#allocation7 + $0x6f4] ss:$24 sps:$4 sm:$0xff]  }
  0xca   :  { %2094 = vmatprep.subr.bf16.mxu1 %v4949_v47  ;;  %v5033_v46 = vld [vmem:[#allocation7 + $0x6fc] ss:$24 sps:$4 sm:$0xff]   ;;  %v5028_v47 = vld [vmem:[#allocation7 + $0x6f0] ss:$24 sps:$4 sm:$0xff]  }
  0xcc   :  { %1972 = vmatpush1.bf16.msra.mxu0 %v4944_v48  ;;  %v5031_v48 = vld [vmem:[#allocation7 + $0x6f8] ss:$24 sps:$4 sm:$0xff]  }
  0xcd   :  { %2095 = vmatpush1.bf16.msra.mxu1 %v4947_v49  ;;  %1973 = vmatprep.subr.bf16.mxu0 %v4952_v50  ;;  %v5036_v49 = vld [vmem:[#allocation7 + $0x724] ss:$24 sps:$4 sm:$0xff]  }
  0xce   :  { %2096 = vmatprep.subr.bf16.mxu1 %v4955_v51  ;;  %v5039_v50 = vld [vmem:[#allocation7 + $0x72c] ss:$24 sps:$4 sm:$0xff]   ;;  %v5034_v51 = vld [vmem:[#allocation7 + $0x720] ss:$24 sps:$4 sm:$0xff]  }
  0xd0   :  { %1974 = vmatpush1.bf16.msra.mxu0 %v4950_v52  ;;  %v5037_v52 = vld [vmem:[#allocation7 + $0x728] ss:$24 sps:$4 sm:$0xff]  }
  0xd1   :  { %2097 = vmatpush1.bf16.msra.mxu1 %v4953_v53  ;;  %1975 = vmatprep.subr.bf16.mxu0 %v4958_v54  ;;  %v5042_v53 = vld [vmem:[#allocation7 + $0x754] ss:$24 sps:$4 sm:$0xff]  }
  0xd2   :  { %2098 = vmatprep.subr.bf16.mxu1 %v4961_v55  ;;  %v5045_v54 = vld [vmem:[#allocation7 + $0x75c] ss:$24 sps:$4 sm:$0xff]   ;;  %v5040_v55 = vld [vmem:[#allocation7 + $0x750] ss:$24 sps:$4 sm:$0xff]  }
  0xd4   :  { %1976 = vmatpush1.bf16.msra.mxu0 %v4956_v56  ;;  %v5043_v56 = vld [vmem:[#allocation7 + $0x758] ss:$24 sps:$4 sm:$0xff]  }
  0xd5   :  { %2099 = vmatpush1.bf16.msra.mxu1 %v4959_v57  ;;  %1977 = vmatprep.subr.bf16.mxu0 %v4964_v58  ;;  %v5048_v57 = vld [vmem:[#allocation7 + $0x784] ss:$24 sps:$4 sm:$0xff]  }
  0xd6   :  { %2100 = vmatprep.subr.bf16.mxu1 %v4967_v59  ;;  %v5051_v58 = vld [vmem:[#allocation7 + $0x78c] ss:$24 sps:$4 sm:$0xff]   ;;  %v5046_v59 = vld [vmem:[#allocation7 + $0x780] ss:$24 sps:$4 sm:$0xff]  }
  0xd8   :  { %1978 = vmatpush1.bf16.msra.mxu0 %v4962_v61  ;;  %v5049_v61 = vld [vmem:[#allocation7 + $0x788] ss:$24 sps:$4 sm:$0xff]  }
  0xd9   :  { %2101 = vmatpush1.bf16.msra.mxu1 %v4965_v62  ;;  %1979 = vmatprep.subr.bf16.mxu0 %v4970_v63  ;;  %v5054_v62 = vld [vmem:[#allocation7 + $0x7b4] ss:$24 sps:$4 sm:$0xff]  }
  0xda   :  { %2102 = vmatprep.subr.bf16.mxu1 %v4973_v0  ;;  %v5057_v63 = vld [vmem:[#allocation7 + $0x7bc] ss:$24 sps:$4 sm:$0xff]   ;;  %v5052_v0 = vld [vmem:[#allocation7 + $0x7b0] ss:$24 sps:$4 sm:$0xff]  }
  0xdc   :  { %1980 = vmatpush1.bf16.msra.mxu0 %v4968_v1  ;;  %v5055_v1 = vld [vmem:[#allocation7 + $0x7b8] ss:$24 sps:$4 sm:$0xff]  }
  0xdd   :  { %2103 = vmatpush1.bf16.msra.mxu1 %v4971_v2  ;;  %1981 = vmatprep.subr.bf16.mxu0 %v4976_v3  ;;  %v5060_v2 = vld [vmem:[#allocation7 + $0x7e4] ss:$24 sps:$4 sm:$0xff]  }
  0xde   :  { %2104 = vmatprep.subr.bf16.mxu1 %v4979_v4  ;;  %v5063_v3 = vld [vmem:[#allocation7 + $0x7ec] ss:$24 sps:$4 sm:$0xff]   ;;  %v5058_v4 = vld [vmem:[#allocation7 + $0x7e0] ss:$24 sps:$4 sm:$0xff]  }
  0xe0   :  { %1982 = vmatpush1.bf16.msra.mxu0 %v4974_v5  ;;  %v5061_v5 = vld [vmem:[#allocation7 + $0x7e8] ss:$24 sps:$4 sm:$0xff]  }
  0xe1   :  { %2105 = vmatpush1.bf16.msra.mxu1 %v4977_v6  ;;  %1983 = vmatprep.subr.bf16.mxu0 %v4982_v7  ;;  %v5066_v6 = vld [vmem:[#allocation7 + $0x814] ss:$24 sps:$4 sm:$0xff]  }
  0xe2   :  { %2106 = vmatprep.subr.bf16.mxu1 %v4985_v8  ;;  %v5069_v7 = vld [vmem:[#allocation7 + $0x81c] ss:$24 sps:$4 sm:$0xff]   ;;  %v5064_v8 = vld [vmem:[#allocation7 + $0x810] ss:$24 sps:$4 sm:$0xff]  }
  0xe4   :  { %1984 = vmatpush1.bf16.msra.mxu0 %v4980_v9  ;;  %v5067_v9 = vld [vmem:[#allocation7 + $0x818] ss:$24 sps:$4 sm:$0xff]  }
  0xe5   :  { %2107 = vmatpush1.bf16.msra.mxu1 %v4983_v10  ;;  %1985 = vmatprep.subr.bf16.mxu0 %v4988_v11  ;;  %v5072_v10 = vld [vmem:[#allocation7 + $0x844] ss:$24 sps:$4 sm:$0xff]  }
  0xe6   :  { %2108 = vmatprep.subr.bf16.mxu1 %v4991_v12  ;;  %v5075_v11 = vld [vmem:[#allocation7 + $0x84c] ss:$24 sps:$4 sm:$0xff]   ;;  %v5070_v12 = vld [vmem:[#allocation7 + $0x840] ss:$24 sps:$4 sm:$0xff]  }
  0xe8   :  { %1986 = vmatpush1.bf16.msra.mxu0 %v4986_v13  ;;  %v5073_v13 = vld [vmem:[#allocation7 + $0x848] ss:$24 sps:$4 sm:$0xff]  }
  0xe9   :  { %2109 = vmatpush1.bf16.msra.mxu1 %v4989_v14  ;;  %1987 = vmatprep.subr.bf16.mxu0 %v4994_v15  ;;  %v5078_v14 = vld [vmem:[#allocation7 + $0x874] ss:$24 sps:$4 sm:$0xff]  }
  0xea   :  { %2110 = vmatprep.subr.bf16.mxu1 %v4997_v17  ;;  %v5081_v15 = vld [vmem:[#allocation7 + $0x87c] ss:$24 sps:$4 sm:$0xff]   ;;  %v5076_v17 = vld [vmem:[#allocation7 + $0x870] ss:$24 sps:$4 sm:$0xff]  }
  0xec   :  { %1988 = vmatpush1.bf16.msra.mxu0 %v4992_v20  ;;  %v5079_v20 = vld [vmem:[#allocation7 + $0x878] ss:$24 sps:$4 sm:$0xff]  }
  0xed   :  { %2111 = vmatpush1.bf16.msra.mxu1 %v4995_v21  ;;  %1998 = vmatprep.subr.bf16.mxu0 %v5000_v23  ;;  %v5084_v21 = vld [vmem:[#allocation7 + $0x8a4] ss:$24 sps:$4 sm:$0xff]  }
  0xee   :  { %2121 = vmatprep.subr.bf16.mxu1 %v5003_v24  ;;  %v5087_v23 = vld [vmem:[#allocation7 + $0x8ac] ss:$24 sps:$4 sm:$0xff]   ;;  %v5082_v24 = vld [vmem:[#allocation7 + $0x8a0] ss:$24 sps:$4 sm:$0xff]  }
  0xef   :  { %1990 = vmatmul.mubr.bf16.vlgmr.msra.gmra.mrb[0].mxu0 %v5563_v26 }
  0xf0   :  { %2113 = vmatmul.mubr.bf16.vlgmr.msra.gmra.mrb[0].mxu1 %v5563_v26  ;;  %1999 = vmatpush1.bf16.msra.mxu0 %v4998_v25  ;;  %v5085_v25 = vld [vmem:[#allocation7 + $0x8a8] ss:$24 sps:$4 sm:$0xff]  }
  0xf1   :  { %2122 = vmatpush1.bf16.msra.mxu1 %v5001_v27  ;;  %2000 = vmatprep.subr.bf16.mxu0 %v5006_v28  ;;  %v5090_v27 = vld [vmem:[#allocation7 + $0x8d4] ss:$24 sps:$4 sm:$0xff]  }
  0xf2   :  { %2123 = vmatprep.subr.bf16.mxu1 %v5009_v29  ;;  %2030 = vmatprep.mubr.bf16.mxu0 %v5549_v18  ;;  %v5093_v28 = vld [vmem:[#allocation7 + $0x8dc] ss:$24 sps:$4 sm:$0xff]   ;;  %v5088_v29 = vld [vmem:[#allocation7 + $0x8d0] ss:$24 sps:$4 sm:$0xff]  }
  0xf3   :  { %2153 = vmatprep.mubr.bf16.mxu1 %v5549_v18 }
  0xf4   :  { %2001 = vmatpush1.bf16.msra.mxu0 %v5004_v30  ;;  %v5091_v30 = vld [vmem:[#allocation7 + $0x8d8] ss:$24 sps:$4 sm:$0xff]  }
  0xf5   :  { %2124 = vmatpush1.bf16.msra.mxu1 %v5007_v31  ;;  %2002 = vmatprep.subr.bf16.mxu0 %v5012_v32  ;;  %v5097_v31 = vld [vmem:[#allocation7 + $0x14] ss:$24 sps:$4 sm:$0xff]   ;;  %v5095_v32 = vld [vmem:[#allocation7 + $0x10] ss:$24 sps:$4 sm:$0xff]  }
  0xf6   :  { %2125 = vmatprep.subr.bf16.mxu1 %v5015_v33  ;;  %v5100_v33 = vld [vmem:[#allocation7 + $0x44] ss:$24 sps:$4 sm:$0xff]  }
  0xf8   :  { %2003 = vmatpush1.bf16.msra.mxu0 %v5010_v34  ;;  %v5098_v34 = vld [vmem:[#allocation7 + $0x40] ss:$24 sps:$4 sm:$0xff]  }
  0xf9   :  { %2126 = vmatpush1.bf16.msra.mxu1 %v5013_v35  ;;  %2004 = vmatprep.subr.bf16.mxu0 %v5018_v36  ;;  %v5103_v35 = vld [vmem:[#allocation7 + $0x74] ss:$24 sps:$4 sm:$0xff]   ;;  %v5101_v36 = vld [vmem:[#allocation7 + $0x70] ss:$24 sps:$4 sm:$0xff]  }
  0xfa   :  { %2127 = vmatprep.subr.bf16.mxu1 %v5021_v37  ;;  %v5106_v37 = vld [vmem:[#allocation7 + $0xa4] ss:$24 sps:$4 sm:$0xff]  }
  0xfc   :  { %2005 = vmatpush1.bf16.msra.mxu0 %v5016_v38  ;;  %v5104_v38 = vld [vmem:[#allocation7 + $0xa0] ss:$24 sps:$4 sm:$0xff]  }
  0xfd   :  { %2128 = vmatpush1.bf16.msra.mxu1 %v5019_v39  ;;  %2006 = vmatprep.subr.bf16.mxu0 %v5024_v40  ;;  %v5109_v39 = vld [vmem:[#allocation7 + $0xd4] ss:$24 sps:$4 sm:$0xff]   ;;  %v5107_v40 = vld [vmem:[#allocation7 + $0xd0] ss:$24 sps:$4 sm:$0xff]  }
  0xfe   :  { %2129 = vmatprep.subr.bf16.mxu1 %v5027_v41  ;;  %v5112_v41 = vld [vmem:[#allocation7 + $0x104] ss:$24 sps:$4 sm:$0xff]  }
 0x100   :  { %2007 = vmatpush1.bf16.msra.mxu0 %v5022_v43  ;;  %v5110_v43 = vld [vmem:[#allocation7 + $0x100] ss:$24 sps:$4 sm:$0xff]  }
 0x101   :  { %2130 = vmatpush1.bf16.msra.mxu1 %v5025_v44  ;;  %2008 = vmatprep.subr.bf16.mxu0 %v5030_v45  ;;  %v5115_v44 = vld [vmem:[#allocation7 + $0x134] ss:$24 sps:$4 sm:$0xff]   ;;  %v5118_v45 = vld [vmem:[#allocation7 + $0x164] ss:$24 sps:$4 sm:$0xff]  }
 0x102   :  { %2131 = vmatprep.subr.bf16.mxu1 %v5033_v46  ;;  %v5116_v46 = vld [vmem:[#allocation7 + $0x160] ss:$24 sps:$4 sm:$0xff]  }
 0x104   :  { %2009 = vmatpush1.bf16.msra.mxu0 %v5028_v47  ;;  %v5121_v47 = vld [vmem:[#allocation7 + $0x194] ss:$24 sps:$4 sm:$0xff]  }
 0x105   :  { %2132 = vmatpush1.bf16.msra.mxu1 %v5031_v48  ;;  %2010 = vmatprep.subr.bf16.mxu0 %v5036_v49  ;;  %v5119_v48 = vld [vmem:[#allocation7 + $0x190] ss:$24 sps:$4 sm:$0xff]   ;;  %v5124_v49 = vld [vmem:[#allocation7 + $0x1c4] ss:$24 sps:$4 sm:$0xff]  }
 0x106   :  { %2133 = vmatprep.subr.bf16.mxu1 %v5039_v50  ;;  %v5122_v50 = vld [vmem:[#allocation7 + $0x1c0] ss:$24 sps:$4 sm:$0xff]  }
 0x108   :  { %2011 = vmatpush1.bf16.msra.mxu0 %v5034_v51  ;;  %v2501_v51 = vld [vmem:[#allocation10 + $0x18] sm:$0xff] }
 0x109   :  { %2134 = vmatpush1.bf16.msra.mxu1 %v5037_v52  ;;  %2012 = vmatprep.subr.bf16.mxu0 %v5042_v53  ;;  %v5127_v52 = vld [vmem:[#allocation7 + $0x1f4] ss:$24 sps:$4 sm:$0xff]   ;;  %v2504_v53 = vld [vmem:[#allocation10 + $0x78] sm:$0xff] }
 0x10a   :  { %2135 = vmatprep.subr.bf16.mxu1 %v5045_v54  ;;  %v4571_v54 = vcombine.low %v2501_v51, %v2504_v53 }
 0x10c   :  { %2013 = vmatpush1.bf16.msra.mxu0 %v5040_v55  ;;  %v4572_v55 = vcombine.high %v2501_v51, %v2504_v53  ;;  %v5172_v53 = vld [vmem:[#allocation7 + $0x4c4] ss:$24 sps:$4 sm:$0xff]  }
 0x10d   :  { %2136 = vmatpush1.bf16.msra.mxu1 %v5043_v56  ;;  %2014 = vmatprep.subr.bf16.mxu0 %v5048_v57  ;;  %v5125_v56 = vld [vmem:[#allocation7 + $0x1f0] ss:$24 sps:$4 sm:$0xff]   ;;  %v5130_v57 = vld [vmem:[#allocation7 + $0x224] ss:$24 sps:$4 sm:$0xff]  }
 0x10e   :  { %2137 = vmatprep.subr.bf16.mxu1 %v5051_v58  ;;  %v5128_v58 = vld [vmem:[#allocation7 + $0x220] ss:$24 sps:$4 sm:$0xff]  }
 0x110   :  { %2015 = vmatpush1.bf16.msra.mxu0 %v5046_v59  ;;  %v2507_v59 = vld [vmem:[#allocation10 + $0xd8] sm:$0xff] }
 0x111   :  { %2138 = vmatpush1.bf16.msra.mxu1 %v5049_v61  ;;  %2016 = vmatprep.subr.bf16.mxu0 %v5054_v62  ;;  %v5133_v61 = vld [vmem:[#allocation7 + $0x254] ss:$24 sps:$4 sm:$0xff]   ;;  %v2510_v62 = vld [vmem:[#allocation10 + $0x138] sm:$0xff] }
 0x112   :  { %2139 = vmatprep.subr.bf16.mxu1 %v5057_v63  ;;  %v4577_v63 = vcombine.low %v2507_v59, %v2510_v62 }
 0x114   :  { %2017 = vmatpush1.bf16.msra.mxu0 %v5052_v0  ;;  %v4578_v0 = vcombine.high %v2507_v59, %v2510_v62  ;;  %v5173_v59 = vld [vmem:[#allocation7 + $0x4f0] ss:$24 sps:$4 sm:$0xff]   ;;  %v5178_v62 = vld [vmem:[#allocation7 + $0x524] ss:$24 sps:$4 sm:$0xff]  }
 0x115   :  { %2140 = vmatpush1.bf16.msra.mxu1 %v5055_v1  ;;  %2018 = vmatprep.subr.bf16.mxu0 %v5060_v2  ;;  %v5131_v1 = vld [vmem:[#allocation7 + $0x250] ss:$24 sps:$4 sm:$0xff]   ;;  %v5136_v2 = vld [vmem:[#allocation7 + $0x284] ss:$24 sps:$4 sm:$0xff]  }
 0x116   :  { %2141 = vmatprep.subr.bf16.mxu1 %v5063_v3  ;;  %v5134_v3 = vld [vmem:[#allocation7 + $0x280] ss:$24 sps:$4 sm:$0xff]  }
 0x118   :  { %2019 = vmatpush1.bf16.msra.mxu0 %v5058_v4  ;;  %v2513_v4 = vld [vmem:[#allocation10 + $0x198] sm:$0xff] }
 0x119   :  { %2142 = vmatpush1.bf16.msra.mxu1 %v5061_v5  ;;  %2020 = vmatprep.subr.bf16.mxu0 %v5066_v6  ;;  %v5139_v5 = vld [vmem:[#allocation7 + $0x2b4] ss:$24 sps:$4 sm:$0xff]   ;;  %v2516_v6 = vld [vmem:[#allocation10 + $0x1f8] sm:$0xff] }
 0x11a   :  { %2143 = vmatprep.subr.bf16.mxu1 %v5069_v7  ;;  %v4583_v7 = vcombine.low %v2513_v4, %v2516_v6 }
 0x11c   :  { %2021 = vmatpush1.bf16.msra.mxu0 %v5064_v8  ;;  %v4584_v8 = vcombine.high %v2513_v4, %v2516_v6  ;;  %v5187_v4 = vld [vmem:[#allocation7 + $0x5b4] ss:$24 sps:$4 sm:$0xff]   ;;  %v5190_v6 = vld [vmem:[#allocation7 + $0x5e4] ss:$24 sps:$4 sm:$0xff]  }
 0x11d   :  { %2144 = vmatpush1.bf16.msra.mxu1 %v5067_v9  ;;  %2022 = vmatprep.subr.bf16.mxu0 %v5072_v10  ;;  %v5137_v9 = vld [vmem:[#allocation7 + $0x2b0] ss:$24 sps:$4 sm:$0xff]   ;;  %v5142_v10 = vld [vmem:[#allocation7 + $0x2e4] ss:$24 sps:$4 sm:$0xff]  }
 0x11e   :  { %2145 = vmatprep.subr.bf16.mxu1 %v5075_v11  ;;  %v5140_v11 = vld [vmem:[#allocation7 + $0x2e0] ss:$24 sps:$4 sm:$0xff]  }
 0x120   :  { %2023 = vmatpush1.bf16.msra.mxu0 %v5070_v12  ;;  %v2519_v12 = vld [vmem:[#allocation10 + $0x258] sm:$0xff] }
 0x121   :  { %2146 = vmatpush1.bf16.msra.mxu1 %v5073_v13  ;;  %2024 = vmatprep.subr.bf16.mxu0 %v5078_v14  ;;  %v5145_v13 = vld [vmem:[#allocation7 + $0x314] ss:$24 sps:$4 sm:$0xff]   ;;  %v2522_v14 = vld [vmem:[#allocation10 + $0x2b8] sm:$0xff] }
 0x122   :  { %2147 = vmatprep.subr.bf16.mxu1 %v5081_v15  ;;  %v4589_v15 = vcombine.low %v2519_v12, %v2522_v14 }
 0x124   :  { %2025 = vmatpush1.bf16.msra.mxu0 %v5076_v17  ;;  %v4590_v17 = vcombine.high %v2519_v12, %v2522_v14  ;;  %v5199_v12 = vld [vmem:[#allocation7 + $0x674] ss:$24 sps:$4 sm:$0xff]   ;;  %v5202_v14 = vld [vmem:[#allocation7 + $0x6a4] ss:$24 sps:$4 sm:$0xff]  }
 0x125   :  { %2148 = vmatpush1.bf16.msra.mxu1 %v5079_v20  ;;  %2026 = vmatprep.subr.bf16.mxu0 %v5084_v21  ;;  %v5143_v20 = vld [vmem:[#allocation7 + $0x310] ss:$24 sps:$4 sm:$0xff]   ;;  %v5148_v21 = vld [vmem:[#allocation7 + $0x344] ss:$24 sps:$4 sm:$0xff]  }
 0x126   :  { %2149 = vmatprep.subr.bf16.mxu1 %v5087_v23  ;;  %v2525_v23 = vld [vmem:[#allocation10 + $0x318] sm:$0xff] }
 0x128   :  { %2027 = vmatpush1.bf16.msra.mxu0 %v5082_v24  ;;  %v2528_v24 = vld [vmem:[#allocation10 + $0x378] sm:$0xff] }
 0x129   :  { %2150 = vmatpush1.bf16.msra.mxu1 %v5085_v25  ;;  %2028 = vmatprep.subr.bf16.mxu0 %v5090_v27  ;;  %v5146_v25 = vld [vmem:[#allocation7 + $0x340] ss:$24 sps:$4 sm:$0xff]   ;;  %v4596_v27 = vcombine.high %v2525_v23, %v2528_v24 }
 0x12a   :  { %2151 = vmatprep.subr.bf16.mxu1 %v5093_v28  ;;  %v5151_v28 = vld [vmem:[#allocation7 + $0x374] ss:$24 sps:$4 sm:$0xff]  }
 0x12c   :  { %2029 = vmatpush1.bf16.msra.mxu0 %v5088_v29  ;;  %v4595_v29 = vcombine.low %v2525_v23, %v2528_v24  ;;  %v5211_v23 = vld [vmem:[#allocation7 + $0x734] ss:$24 sps:$4 sm:$0xff]  }
 0x12d   :  { %2152 = vmatpush1.bf16.msra.mxu1 %v5091_v30  ;;  %2162 = vmatprep.subr.bf16.mxu0 %v5097_v31  ;;  %v5149_v30 = vld [vmem:[#allocation7 + $0x370] ss:$24 sps:$4 sm:$0xff]   ;;  %v5154_v31 = vld [vmem:[#allocation7 + $0x3a4] ss:$24 sps:$4 sm:$0xff]  }
 0x12e   :  { %2795 = vmatprep.subr.bf16.mxu1 %v4572_v55  ;;  %v5175_v55 = vld [vmem:[#allocation7 + $0x4f4] ss:$24 sps:$4 sm:$0xff]  }
 0x12f   :  { %2031 = vmatmul.mubr.bf16.vlgmr.msra.gmra.mrb[0].mxu0 %v5551_v19  ;;  %v5584_v24 = vld [vmem:[#allocation5] sm:$0xff] }
 0x130   :  { %2154 = vmatmul.mubr.bf16.vlgmr.msra.gmra.mrb[0].mxu1 %v5551_v19  ;;  %2163 = vmatpush1.bf16.msra.mxu0 %v5095_v32  ;;  %v2531_v32 = vld [vmem:[#allocation10 + $0x3d8] sm:$0xff] }
 0x131   :  { %2194 = vmatprep.mubr.bf16.mxu0 %v5543_v60  ;;  %2164 = vmatprep.subr.bf16.mxu0 %v5100_v33  ;;  %v5113_v60 = vld [vmem:[#allocation7 + $0x130] ss:$24 sps:$4 sm:$0xff]   ;;  %v2534_v33 = vld [vmem:[#allocation10 + $0x438] sm:$0xff] }
 0x134   :  { %2165 = vmatpush1.bf16.msra.mxu0 %v5098_v34  ;;  %v4602_v34 = vcombine.high %v2531_v32, %v2534_v33 }
 0x135   :  { %2166 = vmatprep.subr.bf16.mxu0 %v5103_v35  ;;  %v5157_v35 = vld [vmem:[#allocation7 + $0x3d4] ss:$24 sps:$4 sm:$0xff]  }
 0x136   :  { %2796 = vmatpush1.bf16.xpose.msra.mxu1 %v4571_v54  ;;  %v5170_v54 = vld [vmem:[#allocation7 + $0x4c0] ss:$24 sps:$4 sm:$0xff]  }
 0x137   :  { %2797 = vmatprep.subr.bf16.mxu1 %v4578_v0  ;;  %v5181_v0 = vld [vmem:[#allocation7 + $0x554] ss:$24 sps:$4 sm:$0xff]  }
 0x138   :  { %2167 = vmatpush1.bf16.msra.mxu0 %v5101_v36  ;;  %v4601_v36 = vcombine.low %v2531_v32, %v2534_v33 }
 0x139   :  { %2168 = vmatprep.subr.bf16.mxu0 %v5106_v37  ;;  %v5160_v37 = vld [vmem:[#allocation7 + $0x404] ss:$24 sps:$4 sm:$0xff]  }
 0x13c   :  { %2169 = vmatpush1.bf16.msra.mxu0 %v5104_v38  ;;  %v5158_v38 = vld [vmem:[#allocation7 + $0x400] ss:$24 sps:$4 sm:$0xff]  }
 0x13d   :  { %2170 = vmatprep.subr.bf16.mxu0 %v5109_v39  ;;  %v5163_v39 = vld [vmem:[#allocation7 + $0x434] ss:$24 sps:$4 sm:$0xff]  }
 0x13e   :  { %2798 = vmatpush1.bf16.xpose.msra.mxu1 %v4577_v63  ;;  %v5176_v63 = vld [vmem:[#allocation7 + $0x520] ss:$24 sps:$4 sm:$0xff]  }
 0x13f   :  { %2799 = vmatprep.subr.bf16.mxu1 %v4584_v8  ;;  %v5193_v8 = vld [vmem:[#allocation7 + $0x614] ss:$24 sps:$4 sm:$0xff]  }
 0x140   :  { %2171 = vmatpush1.bf16.msra.mxu0 %v5107_v40  ;;  %v2537_v40 = vld [vmem:[#allocation10 + $0x498] sm:$0xff] }
 0x141   :  { %2172 = vmatprep.subr.bf16.mxu0 %v5112_v41  ;;  %v2540_v41 = vld [vmem:[#allocation10 + $0x4f8] sm:$0xff] }
 0x144   :  { %2173 = vmatpush1.bf16.msra.mxu0 %v5110_v43  ;;  %v4608_v43 = vcombine.high %v2537_v40, %v2540_v41 }
 0x145   :  { %2174 = vmatprep.subr.bf16.mxu0 %v5115_v44  ;;  %v5161_v44 = vld [vmem:[#allocation7 + $0x430] ss:$24 sps:$4 sm:$0xff]  }
 0x146   :  { %2800 = vmatpush1.bf16.xpose.msra.mxu1 %v4583_v7  ;;  %v5188_v7 = vld [vmem:[#allocation7 + $0x5e0] ss:$24 sps:$4 sm:$0xff]  }
 0x147   :  { %2801 = vmatprep.subr.bf16.mxu1 %v4590_v17  ;;  %v5205_v17 = vld [vmem:[#allocation7 + $0x6d4] ss:$24 sps:$4 sm:$0xff]  }
 0x148   :  { %2175 = vmatpush1.bf16.msra.mxu0 %v5113_v60  ;;  %v4607_v60 = vcombine.low %v2537_v40, %v2540_v41  ;;  %v5221_v40 = vld [vmem:[#allocation7 + $0x7f0] ss:$24 sps:$4 sm:$0xff]   ;;  %v5226_v41 = vld [vmem:[#allocation7 + $0x824] ss:$24 sps:$4 sm:$0xff]  }
 0x149   :  { %2176 = vmatprep.subr.bf16.mxu0 %v5118_v45  ;;  %v5166_v45 = vld [vmem:[#allocation7 + $0x464] ss:$24 sps:$4 sm:$0xff]  }
 0x14c   :  { %2177 = vmatpush1.bf16.msra.mxu0 %v5116_v46  ;;  %v5164_v46 = vld [vmem:[#allocation7 + $0x460] ss:$24 sps:$4 sm:$0xff]  }
 0x14d   :  { %2178 = vmatprep.subr.bf16.mxu0 %v5121_v47  ;;  %v2543_v47 = vld [vmem:[#allocation10 + $0x558] sm:$0xff] }
 0x14e   :  { %2802 = vmatpush1.bf16.xpose.msra.mxu1 %v4589_v15  ;;  %v5200_v15 = vld [vmem:[#allocation7 + $0x6a0] ss:$24 sps:$4 sm:$0xff]  }
 0x14f   :  { %2803 = vmatprep.subr.bf16.mxu1 %v4596_v27  ;;  %v5214_v27 = vld [vmem:[#allocation7 + $0x764] ss:$24 sps:$4 sm:$0xff]  }
 0x150   :  { %2179 = vmatpush1.bf16.msra.mxu0 %v5119_v48  ;;  %v2546_v48 = vld [vmem:[#allocation10 + $0x5b8] sm:$0xff] }
 0x151   :  { %2180 = vmatprep.subr.bf16.mxu0 %v5124_v49  ;;  %v5169_v49 = vld [vmem:[#allocation7 + $0x494] ss:$24 sps:$4 sm:$0xff]   ;;  %v4613_v51 = vcombine.low %v2543_v47, %v2546_v48 }
 0x154   :  { %2181 = vmatpush1.bf16.msra.mxu0 %v5122_v50  ;;  %v4614_v50 = vcombine.high %v2543_v47, %v2546_v48  ;;  %v5227_v48 = vld [vmem:[#allocation7 + $0x850] ss:$24 sps:$4 sm:$0xff]  }
 0x155   :  { %2182 = vmatprep.subr.bf16.mxu0 %v5127_v52  ;;  %v5167_v52 = vld [vmem:[#allocation7 + $0x490] ss:$24 sps:$4 sm:$0xff]  }
 0x156   :  { %2804 = vmatpush1.bf16.xpose.msra.mxu1 %v4595_v29 }
 0x157   :  { %2805 = vmatprep.subr.bf16.mxu1 %v4602_v34  ;;  %v5215_v34 = vld [vmem:[#allocation7 + $0x790] ss:$24 sps:$4 sm:$0xff]  }
 0x158   :  { %2183 = vmatpush1.bf16.msra.mxu0 %v5125_v56  ;;  %v5574_v56 = vld [vmem:[#allocation10 + $0x20] sm:$0xff] }
 0x159   :  { %2184 = vmatprep.subr.bf16.mxu0 %v5130_v57  ;;  %v5576_v57 = vld [vmem:[#allocation10 + $0x80] sm:$0xff] }
 0x15c   :  { %2185 = vmatpush1.bf16.msra.mxu0 %v5128_v58  ;;  %v4574_v58 = vcombine.high %v5574_v56, %v5576_v57 }
 0x15d   :  { %2186 = vmatprep.subr.bf16.mxu0 %v5133_v61  ;;  %v4573_v61 = vcombine.low %v5574_v56, %v5576_v57  ;;  %v2517_v56 = vld [vmem:[#allocation10 + $0x200] sm:$0xff] }
 0x15e   :  { %2806 = vmatpush1.bf16.xpose.msra.mxu1 %v4601_v36 }
 0x15f   :  { %2807 = vmatprep.subr.bf16.mxu1 %v4608_v43 }
 0x160   :  { %2187 = vmatpush1.bf16.msra.mxu0 %v5131_v1  ;;  %v5179_v1 = vld [vmem:[#allocation7 + $0x550] ss:$24 sps:$4 sm:$0xff]  }
 0x161   :  { %2188 = vmatprep.subr.bf16.mxu0 %v5136_v2  ;;  %v5184_v2 = vld [vmem:[#allocation7 + $0x584] ss:$24 sps:$4 sm:$0xff]  }
 0x164   :  { %2189 = vmatpush1.bf16.msra.mxu0 %v5134_v3  ;;  %v5182_v3 = vld [vmem:[#allocation7 + $0x580] ss:$24 sps:$4 sm:$0xff]  }
 0x165   :  { %2190 = vmatprep.subr.bf16.mxu0 %v5139_v5  ;;  %v5185_v5 = vld [vmem:[#allocation7 + $0x5b0] ss:$24 sps:$4 sm:$0xff]  }
 0x166   :  { %2808 = vmatpush1.bf16.xpose.msra.mxu1 %v4607_v60  ;;  %v5224_v60 = vld [vmem:[#allocation7 + $0x820] ss:$24 sps:$4 sm:$0xff]  }
 0x167   :  { %2809 = vmatprep.subr.bf16.mxu1 %v4614_v50 }
 0x168   :  { %2191 = vmatpush1.bf16.msra.mxu0 %v5137_v9  ;;  %v5191_v9 = vld [vmem:[#allocation7 + $0x610] ss:$24 sps:$4 sm:$0xff]  }
 0x169   :  { %2192 = vmatprep.subr.bf16.mxu0 %v5142_v10  ;;  %v5196_v10 = vld [vmem:[#allocation7 + $0x644] ss:$24 sps:$4 sm:$0xff]  }
 0x16c   :  { %2193 = vmatpush1.bf16.msra.mxu0 %v5140_v11  ;;  %v5194_v11 = vld [vmem:[#allocation7 + $0x640] ss:$24 sps:$4 sm:$0xff]  }
 0x16d   :  { %2203 = vmatprep.subr.bf16.mxu0 %v5145_v13  ;;  %v5197_v13 = vld [vmem:[#allocation7 + $0x670] ss:$24 sps:$4 sm:$0xff]  }
 0x16e   :  { %2810 = vmatpush1.bf16.xpose.msra.mxu1 %v4613_v51 }
 0x16f   :  { %2195 = vmatmul.mubr.bf16.vlgmr.msra.gmra.mrb[4].mxu0 %v5547_v16  ;;  %v5152_v16 = vld [vmem:[#allocation7 + $0x3a0] ss:$24 sps:$4 sm:$0xff]   ;;  %2835 = vmatprep.subr.bf16.mxu1 %v4574_v58  ;;  %v5233_v58 = vld [vmem:[#allocation7 + $0x8b0] ss:$24 sps:$4 sm:$0xff]  }
 0x170   :  { %2204 = vmatpush1.bf16.msra.mxu0 %v5143_v20  ;;  %2235 = vmatprep.mubr.bf16.mxu0 %v5555_v22  ;;  %v5155_v22 = vld [vmem:[#allocation7 + $0x3d0] ss:$24 sps:$4 sm:$0xff]  }
 0x171   :  { %2205 = vmatprep.subr.bf16.mxu0 %v5148_v21  ;;  %v5203_v20 = vld [vmem:[#allocation7 + $0x6d0] ss:$24 sps:$4 sm:$0xff]   ;;  %v5208_v21 = vld [vmem:[#allocation7 + $0x704] ss:$24 sps:$4 sm:$0xff]  }
 0x174   :  { %2206 = vmatpush1.bf16.msra.mxu0 %v5146_v25  ;;  %v5586_v25 = vld [vmem:[#allocation5 + $0x18] sm:$0xff] }
 0x175   :  { %2207 = vmatprep.subr.bf16.mxu0 %v5151_v28  ;;  %v2298_v28 = vunpack.c.h.bf16 %v5584_v24  ;;  %v2304_v29 = vunpack.c.h.bf16 %v5586_v25 }
 0x177   :  { %v2315_v32 = vrot.slane %v2298_v28, 4  ;;  %v2351_v33 = vrot.slane %v2304_v29, 4 }
 0x178   :  { %2208 = vmatpush1.bf16.msra.mxu0 %v5149_v30  ;;  %v5212_v30 = vld [vmem:[#allocation7 + $0x760] ss:$24 sps:$4 sm:$0xff]  }
 0x179   :  { %2209 = vmatprep.subr.bf16.mxu0 %v5154_v31  ;;  %v5217_v31 = vld [vmem:[#allocation7 + $0x794] ss:$24 sps:$4 sm:$0xff]   ;;  %v2352_v36 = vmax.f32 %v2304_v29, %v2351_v33 }
 0x17c   :  { %2210 = vmatpush1.bf16.msra.mxu0 %v5152_v16  ;;  %v5220_v16 = vld [vmem:[#allocation7 + $0x7c4] ss:$24 sps:$4 sm:$0xff]  }
 0x17d   :  { %2211 = vmatprep.subr.bf16.mxu0 %v5157_v35  ;;  %v2316_v35 = vmax.f32 %v2298_v28, %v2315_v32 }
 0x180   :  { %2212 = vmatpush1.bf16.msra.mxu0 %v5155_v22  ;;  %v5218_v22 = vld [vmem:[#allocation7 + $0x7c0] ss:$24 sps:$4 sm:$0xff]  }
 0x181   :  { %2213 = vmatprep.subr.bf16.mxu0 %v5160_v37  ;;  %v5223_v37 = vld [vmem:[#allocation7 + $0x7f4] ss:$24 sps:$4 sm:$0xff]  }
 0x184   :  { %2214 = vmatpush1.bf16.msra.mxu0 %v5158_v38  ;;  %v2317_v38 = vrot.slane %v2316_v35, 2 }
 0x185   :  { %2215 = vmatprep.subr.bf16.mxu0 %v5163_v39  ;;  %v2353_v39 = vrot.slane %v2352_v36, 2 }
 0x186   :  { %v2318_v43 = vmax.f32 %v2316_v35, %v2317_v38 }
 0x188   :  { %2216 = vmatpush1.bf16.msra.mxu0 %v5161_v44  ;;  %v2354_v44 = vmax.f32 %v2352_v36, %v2353_v39 }
 0x189   :  { %2217 = vmatprep.subr.bf16.mxu0 %v5166_v45  ;;  %v5229_v45 = vld [vmem:[#allocation7 + $0x854] ss:$24 sps:$4 sm:$0xff]  }
 0x18a   :  { %v2355_v47 = vrot.slane %v2354_v44, 1 }
 0x18c   :  { %2218 = vmatpush1.bf16.msra.mxu0 %v5164_v46  ;;  %v2319_v46 = vrot.slane %v2318_v43, 1  ;;  %v5592_v51 = vmax.f32 %v2354_v44, %v2355_v47  ;;  %v402_v44 = vsub.s32 2, %v5540_v42 }
 0x18d   :  { %2219 = vmatprep.subr.bf16.mxu0 %v5169_v49  ;;  %v5232_v49 = vld [vmem:[#allocation7 + $0x884] ss:$24 sps:$4 sm:$0xff]  }
 0x18e   :  { %v5590_v50 = vmax.f32 %v2318_v43, %v2319_v46  ;;  %v5611_v46 = vld [vmem:[#allocation5 + $0x10] sm:$0xff] }
 0x190   :  { %2220 = vmatpush1.bf16.msra.mxu0 %v5167_v52  ;;  %v5230_v52 = vld [vmem:[#allocation7 + $0x880] ss:$24 sps:$4 sm:$0xff]  }
 0x191   :  { %2221 = vmatprep.subr.bf16.mxu0 %v5172_v53  ;;  %v5235_v53 = vld [vmem:[#allocation7 + $0x8b4] ss:$24 sps:$4 sm:$0xff]  }
 0x194   :  { %2222 = vmatpush1.bf16.msra.mxu0 %v5170_v54  ;;  %v2490_v54 = vpack.c.bf16 %v5590_v50, %v5590_v50 }
 0x195   :  { %2223 = vmatprep.subr.bf16.mxu0 %v5175_v55  ;;  %v2496_v55 = vpack.c.bf16 %v5592_v51, %v5592_v51 }
 0x198   :  { %2224 = vmatpush1.bf16.msra.mxu0 %v5173_v59  ;;  %v5238_v59 = vld [vmem:[#allocation7 + $0x8e4] ss:$24 sps:$4 sm:$0xff]  }
 0x199   :  { %2225 = vmatprep.subr.bf16.mxu0 %v5178_v62  ;;  %v2928_v62 = vunpack.c.l.b16 %v2490_v54 }
 0x19c   :  { %2226 = vmatpush1.bf16.msra.mxu0 %v5176_v63  ;;  %v2934_v63 = vunpack.c.l.b16 %v2496_v55 }
 0x19d   :  { %2227 = vmatprep.subr.bf16.mxu0 %v5181_v0  ;;  %v2441_v0 = vld [vmem:[#allocation10] sm:$0xff] }
 0x1a0   :  { %2228 = vmatpush1.bf16.msra.mxu0 %v5179_v1  ;;  %v2444_v1 = vld [vmem:[#allocation10 + $0x60] sm:$0xff] }
 0x1a1   :  { %2229 = vmatprep.subr.bf16.mxu0 %v5184_v2  ;;  %v5236_v2 = vld [vmem:[#allocation7 + $0x8e0] ss:$24 sps:$4 sm:$0xff]  }
 0x1a4   :  { %2230 = vmatpush1.bf16.msra.mxu0 %v5182_v3  ;;  %v4620_v3 = vcombine.high %v2441_v0, %v2444_v1 }
 0x1a5   :  { %2231 = vmatprep.subr.bf16.mxu0 %v5187_v4  ;;  %v2941_v4 = vsel %vm2939_vm0, %v2934_v63, %v2928_v62 }
 0x1a8   :  { %2232 = vmatpush1.bf16.msra.mxu0 %v5185_v5  ;;  %v2947_v5 = vpack.c.b16 %v2941_v4, %v2941_v4 }
 0x1a9   :  { %2233 = vmatprep.subr.bf16.mxu0 %v5190_v6  ;;  %v2447_v6 = vld [vmem:[#allocation10 + $0xc0] sm:$0xff] }
 0x1ac   :  { %2234 = vmatpush1.bf16.msra.mxu0 %v5188_v7  ;;  %v2450_v7 = vld [vmem:[#allocation10 + $0x120] sm:$0xff] }
 0x1ad   :  { %2244 = vmatprep.subr.bf16.mxu0 %v5193_v8  ;;  %v4619_v8 = vcombine.low %v2441_v0, %v2444_v1 }
 0x1af   :  { %2236 = vmatmul.mubr.bf16.vlgmr.msra.gmra.mrb[4].mxu0 %v5563_v26  ;;  %v5206_v26 = vld [vmem:[#allocation7 + $0x700] ss:$24 sps:$4 sm:$0xff]  }
 0x1b0   :  { %2245 = vmatpush1.bf16.msra.mxu0 %v5191_v9  ;;  %2276 = vmatprep.mubr.bf16.mxu0 %v5549_v18  ;;  %v5209_v18 = vld [vmem:[#allocation7 + $0x730] ss:$24 sps:$4 sm:$0xff]   ;;  %v4626_v9 = vcombine.high %v2447_v6, %v2450_v7 }
 0x1b1   :  { %2246 = vmatprep.subr.bf16.mxu0 %v5196_v10  ;;  %v2453_v10 = vld [vmem:[#allocation10 + $0x180] sm:$0xff] }
 0x1b4   :  { %2247 = vmatpush1.bf16.msra.mxu0 %v5194_v11  ;;  %v2456_v11 = vld [vmem:[#allocation10 + $0x1e0] sm:$0xff] }
 0x1b5   :  { %2248 = vmatprep.subr.bf16.mxu0 %v5199_v12  ;;  %v4625_v12 = vcombine.low %v2447_v6, %v2450_v7 }
 0x1b8   :  { %2249 = vmatpush1.bf16.msra.mxu0 %v5197_v13  ;;  %v4632_v13 = vcombine.high %v2453_v10, %v2456_v11 }
 0x1b9   :  { %2250 = vmatprep.subr.bf16.mxu0 %v5202_v14  ;;  %v394_v14 = vsub.s32 0, %v5540_v42 }
 0x1bc   :  { %2251 = vmatpush1.bf16.msra.mxu0 %v5200_v15  ;;  %v5601_v15 = vld [vmem:[#allocation8] sm:$0x3f] }
 0x1bd   :  { %2252 = vmatprep.subr.bf16.mxu0 %v5205_v17  ;;  %v398_v17 = vsub.s32 1, %v5540_v42  ;;  %v403_v63 = vrot.slane %v5601_v15, %v402_v44 }
 0x1c0   :  { %2253 = vmatpush1.bf16.msra.mxu0 %v5203_v20  ;;  %v406_v20 = vsub.s32 3, %v5540_v42 }
 0x1c1   :  { %2254 = vmatprep.subr.bf16.mxu0 %v5208_v21  ;;  %v395_v21 = vrot.slane %v5601_v15, %v394_v14  ;;  %v5618_v14 = vld [vmem:[#allocation10 + $0xe0] sm:$0xff] }
 0x1c2   :  { %v407_v28 = vrot.slane %v5601_v15, %v406_v20 }
 0x1c4   :  { %2255 = vmatpush1.bf16.msra.mxu0 %v5206_v26  ;;  %v2459_v26 = vld [vmem:[#allocation10 + $0x240] sm:$0xff] }
 0x1c5   :  { %2256 = vmatprep.subr.bf16.mxu0 %v5211_v23  ;;  %v2462_v23 = vld [vmem:[#allocation10 + $0x2a0] sm:$0xff] }
 0x1c6   :  { %v4637_v0 = vcombine.low %v2459_v26, %v2462_v23 }
 0x1c8   :  { %2257 = vmatpush1.bf16.msra.mxu0 %v5209_v18  ;;  %v2303_v18 = vunpack.c.l.bf16 %v5586_v25 }
 0x1c9   :  { %2258 = vmatprep.subr.bf16.mxu0 %v5214_v27  ;;  %v399_v27 = vrot.slane %v5601_v15, %v398_v17 }
 0x1cc   :  { %2259 = vmatpush1.bf16.msra.mxu0 %v5212_v30  ;;  %v2292_v30 = vld [vmem:[#allocation5 + $0x8] sm:$0xff] }
 0x1cd   :  { %2260 = vmatprep.subr.bf16.mxu0 %v5217_v31  ;;  %v4631_v31 = vcombine.low %v2453_v10, %v2456_v11  ;;  %v2299_v43 = vunpack.c.l.bf16 %v2292_v30 }
 0x1cf   :  { %v2321_v62 = vrot.slane %v2299_v43, 4 }
 0x1d0   :  { %2261 = vmatpush1.bf16.msra.mxu0 %v5215_v34  ;;  %v4638_v34 = vcombine.high %v2459_v26, %v2462_v23  ;;  %v2474_v26 = vld [vmem:[#allocation10 + $0x420] sm:$0xff] }
 0x1d1   :  { %2262 = vmatprep.subr.bf16.mxu0 %v5220_v16  ;;  %v2295_v16 = vld [vmem:[#allocation5 + $0x20] sm:$0xff] }
 0x1d2   :  { %v2305_v47 = vunpack.c.l.bf16 %v2295_v16 }
 0x1d4   :  { %2263 = vmatpush1.bf16.msra.mxu0 %v5218_v22  ;;  %v2345_v22 = vrot.slane %v2303_v18, 4 }
 0x1d5   :  { %2264 = vmatprep.subr.bf16.mxu0 %v5223_v37  ;;  %v2300_v37 = vunpack.c.h.bf16 %v2292_v30 }
 0x1d6   :  { %v2346_v54 = vmax.f32 %v2303_v18, %v2345_v22 }
 0x1d7   :  { %v2327_v55 = vrot.slane %v2300_v37, 4 }
 0x1d8   :  { %2265 = vmatpush1.bf16.msra.mxu0 %v5221_v40 }
 0x1d9   :  { %2266 = vmatprep.subr.bf16.mxu0 %v5226_v41 }
 0x1dc   :  { %2267 = vmatpush1.bf16.msra.mxu0 %v5224_v60 }
 0x1dd   :  { %2268 = vmatprep.subr.bf16.mxu0 %v5229_v45 }
 0x1e0   :  { %2269 = vmatpush1.bf16.msra.mxu0 %v5227_v48  ;;  %v5613_v48 = vld [vmem:[#allocation5 + $0x28] sm:$0xff] }
 0x1e1   :  { %2270 = vmatprep.subr.bf16.mxu0 %v5232_v49  ;;  %v2306_v49 = vunpack.c.h.bf16 %v2295_v16  ;;  %v2308_v1 = vunpack.c.h.bf16 %v5613_v48 }
 0x1e3   :  { %v2363_v4 = vrot.slane %v2306_v49, 4  ;;  %v2375_v11 = vrot.slane %v2308_v1, 4 }
 0x1e4   :  { %2271 = vmatpush1.bf16.msra.mxu0 %v5230_v52  ;;  %v2465_v52 = vld [vmem:[#allocation10 + $0x300] sm:$0xff] }
 0x1e5   :  { %2272 = vmatprep.subr.bf16.mxu0 %v5235_v53  ;;  %v2468_v53 = vld [vmem:[#allocation10 + $0x360] sm:$0xff] }
 0x1e6   :  { %v4643_v30 = vcombine.low %v2465_v52, %v2468_v53 }
 0x1e8   :  { %2273 = vmatpush1.bf16.msra.mxu0 %v5233_v58 }
 0x1e9   :  { %2274 = vmatprep.subr.bf16.mxu0 %v5238_v59  ;;  %v2302_v59 = vunpack.c.h.bf16 %v5611_v46 }
 0x1eb   :  { %v2339_v7 = vrot.slane %v2302_v59, 4 }
 0x1ec   :  { %2275 = vmatpush1.bf16.msra.mxu0 %v5236_v2  ;;  %v2357_v2 = vrot.slane %v2305_v47, 4 }
 0x1ed   :  { %3198 = vmatprep.subr.bf16.mxu0 %v4620_v3  ;;  %v4644_v3 = vcombine.high %v2465_v52, %v2468_v53  ;;  %v2340_v18 = vmax.f32 %v2302_v59, %v2339_v7 }
 0x1ef   :  { %2277 = vmatmul.mubr.bf16.vlgmr.msra.gmra.mrb[4].mxu0 %v5551_v19  ;;  %v2297_v19 = vunpack.c.l.bf16 %v5584_v24 }
 0x1f0   :  { %3230 = vmatprep.mubr.bf16.mxu0 %v2947_v5  ;;  %v2347_v5 = vrot.slane %v2346_v54, 2 }
 0x1f1   :  { %v2309_v29 = vrot.slane %v2297_v19, 4 }
 0x1f2   :  { %v2348_v17 = vmax.f32 %v2346_v54, %v2347_v5  ;;  %v5649_v54 = vld [vmem:[#allocation10 + $0x1a0] sm:$0xff] }
 0x1f3   :  { %v2310_v41 = vmax.f32 %v2297_v19, %v2309_v29  ;;  %v5622_v19 = vld [vmem:[#allocation10 + $0x140] sm:$0xff]  ;;  %v4586_v5 = vcombine.high %v5649_v54, %v2517_v56 }
 0x1f4   :  { %v2349_v22 = vrot.slane %v2348_v17, 1 }
 0x1f5   :  { %3199 = vmatpush1.bf16.xpose.msra.mxu0 %v4619_v8  ;;  %v2311_v58 = vrot.slane %v2310_v41, 2  ;;  %v2328_v8 = vmax.f32 %v2300_v37, %v2327_v55 }
 0x1f6   :  { %3200 = vmatprep.subr.bf16.mxu0 %v4626_v9  ;;  %v2322_v9 = vmax.f32 %v2299_v43, %v2321_v62 }
 0x1f7   :  { %v2312_v6 = vmax.f32 %v2310_v41, %v2311_v58 }
 0x1f9   :  { %v2313_v23 = vrot.slane %v2312_v6, 1 }
 0x1fd   :  { %3201 = vmatpush1.bf16.xpose.msra.mxu0 %v4625_v12  ;;  %v2358_v12 = vmax.f32 %v2305_v47, %v2357_v2  ;;  %v2480_v47 = vld [vmem:[#allocation10 + $0x4e0] sm:$0xff] }
 0x1fe   :  { %3202 = vmatprep.subr.bf16.mxu0 %v4632_v13  ;;  %v2364_v13 = vmax.f32 %v2306_v49, %v2363_v4  ;;  %v5644_v49 = vmax.f32 %v2348_v17, %v2349_v22 }
 0x200   :  { %v2365_v16 = vrot.slane %v2364_v13, 2 }
 0x202   :  { %v2032_v32 = vpop.f32.mrb[0].mxu0  ;;  %v2366_v44 = vmax.f32 %v2364_v13, %v2365_v16 }
 0x203   :  { %v2155_v33 = vpop.f32.mrb[0].mxu1  ;;  %v4764_v24 = vadd.f32 %v2032_v32, %v395_v21  ;;  %v2034_v35 = vpop.f32.mrb[1].mxu0  ;;  %v2471_v21 = vld [vmem:[#allocation10 + $0x3c0] sm:$0xff]  ;;  %v2359_v32 = vrot.slane %v2358_v12, 2 }
 0x204   :  { %v2157_v36 = vpop.f32.mrb[1].mxu1  ;;  %v4765_v38 = vadd.f32 %v2034_v35, %v399_v27  ;;  %v2036_v40 = vpop.f32.mrb[2].mxu0  ;;  %v4766_v10 = vadd.f32 %v2155_v33, %v403_v63  ;;  %v2329_v27 = vrot.slane %v2328_v8, 2  ;;  %v4580_v35 = vcombine.high %v5618_v14, %v5622_v19 }
 0x205   :  { %v4767_v39 = vadd.f32 %v2157_v36, %v407_v28  ;;  %v2159_v25 = vpop.f32.mrb[2].mxu1  ;;  %v2037_v60 = vpop.f32.mrb[3].mxu0  ;;  %3203 = vmatpush1.bf16.xpose.msra.mxu0 %v4631_v31  ;;  %5239 = vtanh.f32 %v4764_v24  ;;  %v2323_v28 = vrot.slane %v2322_v9, 2  ;;  %v2376_v31 = vmax.f32 %v2308_v1, %v2375_v11 }
 0x206   :  { %v2160_v45 = vpop.f32.mrb[3].mxu1  ;;  %3204 = vmatprep.subr.bf16.mxu0 %v4638_v34  ;;  %5241 = vtanh.f32 %v4765_v38  ;;  %v4650_v36 = vcombine.high %v2471_v21, %v2474_v26  ;;  %v2341_v38 = vrot.slane %v2340_v18, 2  ;;  %v5636_v25 = vmax.f32 %v2312_v6, %v2313_v23 }
 0x207   :  { %5243 = vtanh.f32 %v4767_v39  ;;  %v2330_v39 = vmax.f32 %v2328_v8, %v2329_v27  ;;  %v2324_v40 = vmax.f32 %v2322_v9, %v2323_v28  ;;  %v2377_v41 = vrot.slane %v2376_v31, 2  ;;  %v5642_v45 = vld [vmem:[#allocation10 + $0x480] sm:$0xff] }
 0x208   :  { %5245 = vtanh.f32 %v4766_v10  ;;  %v2360_v43 = vmax.f32 %v2358_v12, %v2359_v32  ;;  %v2342_v57 = vmax.f32 %v2340_v18, %v2341_v38  ;;  %v4649_v58 = vcombine.low %v2471_v21, %v2474_v26  ;;  %v5665_v8 = vld [vmem:[#allocation10 + $0x540] sm:$0xff] }
 0x209   :  { %v2325_v55 = vrot.slane %v2324_v40, 1  ;;  %v2378_v59 = vmax.f32 %v2376_v31, %v2377_v41  ;;  %v4656_v1 = vcombine.high %v5642_v45, %v2480_v47  ;;  %v2367_v2 = vrot.slane %v2366_v44, 1  ;;  %v5669_v12 = vld [vmem:[#allocation10 + $0x5a0] sm:$0xff] }
 0x20a   :  { %v2361_v62 = vrot.slane %v2360_v43, 1  ;;  %v2343_v9 = vrot.slane %v2342_v57, 1  ;;  %v4585_v27 = vcombine.low %v5649_v54, %v2517_v56  ;;  %v2520_v31 = vld [vmem:[#allocation10 + $0x260] sm:$0xff] }
 0x20b   :  { %v2379_v13 = vrot.slane %v2378_v59, 1  ;;  %v5673_v21 = vmax.f32 %v2366_v44, %v2367_v2  ;;  %v2523_v32 = vld [vmem:[#allocation10 + $0x2c0] sm:$0xff]  ;;  %v2489_v44 = vpack.c.bf16 %v5636_v25, %v5636_v25 }
 0x20c   :  { %v5676_v23 = vmax.f32 %v2360_v43, %v2361_v62  ;;  %v5683_v16 = vmax.f32 %v2342_v57, %v2343_v9  ;;  %v4592_v43 = vcombine.high %v2520_v31, %v2523_v32  ;;  %v2443_v62 = vld [vmem:[#allocation10 + $0x10] sm:$0xff]  ;;  %v2526_v9 = vld [vmem:[#allocation10 + $0x320] sm:$0xff] }
 0x20d   :  { %3205 = vmatpush1.bf16.xpose.msra.mxu0 %v4637_v0  ;;  %v4579_v0 = vcombine.low %v5618_v14, %v5622_v19  ;;  %v5671_v14 = vmax.f32 %v2324_v40, %v2325_v55 }
 0x20e   :  { %3206 = vmatprep.subr.bf16.mxu0 %v4644_v3  ;;  %v2494_v55 = vpack.c.bf16 %v5683_v16, %v5683_v16 }
 0x20f   :  { %v5620_v20 = vpop.eup %5239 }
 0x210   :  { %v5624_v29 = vpop.eup %5241  ;;  %v2549_v24 = vpack.c.bf16 %v5620_v20, %v5620_v20  ;;  %v2387_v52 = vrot.slane %v5620_v20, 1  ;;  %v2405_v63 = vsub.f32 %v5636_v25, %v5620_v20 }
 0x211   :  { %v5626_v33 = vpop.eup %5243  ;;  %v2550_v34 = vpack.c.bf16 %v5624_v29, %v5624_v29  ;;  %v2388_v60 = vrot.slane %v5624_v29, 1  ;;  %v2406_v53 = vsub.f32 %v5590_v50, %v5624_v29 }
 0x212   :  { %v2552_v37 = vpack.c.bf16 %v5626_v33, %v5626_v33  ;;  %v5659_v4 = vpop.eup %5245  ;;  %v2411_v7 = vsub.f32 %v5644_v49, %v2387_v52  ;;  %v2417_v17 = vand.u32 2147483647, %v2405_v63  ;;  %v2390_v26 = vrot.slane %v5626_v33, 1  ;;  %v2446_v63 = vld [vmem:[#allocation10 + $0x70] sm:$0xff] }
 0x213   :  { %2827 = vmatprep.mubr.bf16.mxu1 %v2550_v34  ;;  %v2412_v3 = vsub.f32 %v5592_v51, %v2388_v60  ;;  %v2418_v6 = vand.u32 2147483647, %v2406_v53  ;;  %v2389_v18 = vrot.slane %v5659_v4, 1  ;;  %v4662_v34 = vcombine.high %v5665_v8, %v5669_v12 }
 0x214   :  { %2828 = vmatmul.mubr.bf16.vlgmr.msra.gmra.mrb[4].mxu1 %v2549_v24  ;;  %v2423_v19 = vand.u32 2147483647, %v2411_v7  ;;  %v2431_v40 = vmul.f32 %v5659_v4, %v5671_v14  ;;  %v4661_v7 = vcombine.low %v5665_v8, %v5669_v12 }
 0x215   :  { %3207 = vmatpush1.bf16.xpose.msra.mxu0 %v4643_v30  ;;  %2836 = vmatpush1.bf16.xpose.msra.mxu1 %v4573_v61  ;;  %v2331_v61 = vrot.slane %v2330_v39, 1  ;;  %v2424_v11 = vand.u32 2147483647, %v2412_v3  ;;  %v3367_v28 = vpack.c.bf16 %v2418_v6, %v2418_v6  ;;  %v4655_v30 = vcombine.low %v5642_v45, %v2480_v47 }
 0x216   :  { %2867 = vmatprep.mubr.bf16.mxu1 %v2552_v37  ;;  %2837 = vmatprep.subr.bf16.mxu1 %v4580_v35  ;;  %v5685_v35 = vmax.f32 %v2378_v59, %v2379_v13  ;;  %v3372_v22 = vpack.c.bf16 %v2423_v19, %v2423_v19  ;;  %v2437_v41 = vmul.f32 %v2389_v18, %v5676_v23 }
 0x217   :  { %3208 = vmatprep.subr.bf16.mxu0 %v4650_v36  ;;  %v5667_v10 = vmax.f32 %v2330_v39, %v2331_v61  ;;  %v3373_v24 = vpack.c.bf16 %v2424_v11, %v2424_v11  ;;  %v3366_v36 = vpack.c.bf16 %v2417_v17, %v2417_v17  ;;  %v2438_v39 = vmul.f32 %v2390_v26, %v5673_v21  ;;  %v2529_v11 = vld [vmem:[#allocation10 + $0x380] sm:$0xff] }
 0x218   :  { %v3391_v45 = vunpack.c.l.b16 %v3367_v28  ;;  %v3396_v47 = vunpack.c.l.b16 %v3372_v22  ;;  %v3843_v57 = vpack.c.bf16 %v2437_v41, %v2437_v41  ;;  %v2495_v61 = vpack.c.bf16 %v5644_v49, %v5644_v49  ;;  %v2532_v41 = vld [vmem:[#allocation10 + $0x3e0] sm:$0xff] }
 0x219   :  { %v2432_v37 = vmul.f32 %v5626_v33, %v5667_v10  ;;  %v3397_v38 = vunpack.c.l.b16 %v3373_v24  ;;  %v3844_v56 = vpack.c.bf16 %v2438_v39, %v2438_v39  ;;  %v3837_v3 = vpack.c.bf16 %v2431_v40, %v2431_v40  ;;  %v2452_v39 = vld [vmem:[#allocation10 + $0x130] sm:$0xff] }
 0x21a   :  { %v3402_v59 = vrot.slane %v3396_v47, 7  ;;  %v3867_v19 = vunpack.c.l.b16 %v3843_v57  ;;  %v2927_v28 = vunpack.c.l.b16 %v2489_v44  ;;  %v4598_v22 = vcombine.high %v2526_v9, %v2529_v11  ;;  %v2458_v57 = vld [vmem:[#allocation10 + $0x1f0] sm:$0xff] }
 0x21b   :  { %v3404_v53 = vrot.slane %v3397_v38, 7  ;;  %v3838_v54 = vpack.c.bf16 %v2432_v37, %v2432_v37  ;;  %v3868_v2 = vunpack.c.l.b16 %v3844_v56  ;;  %v2449_v38 = vld [vmem:[#allocation10 + $0xd0] sm:$0xff]  ;;  %v4623_v44 = vcombine.low %v2443_v62, %v2446_v63 }
 0x21c   :  { %v4597_v47 = vcombine.low %v2526_v9, %v2529_v11  ;;  %v2455_v56 = vld [vmem:[#allocation10 + $0x190] sm:$0xff] }
 0x21d   :  { %3209 = vmatpush1.bf16.xpose.msra.mxu0 %v4649_v58  ;;  %2838 = vmatpush1.bf16.xpose.msra.mxu1 %v4579_v0  ;;  %v3390_v58 = vunpack.c.l.b16 %v3366_v36  ;;  %v2500_v0 = vpack.c.bf16 %v5685_v35, %v5685_v35  ;;  %v3862_v13 = vunpack.c.l.b16 %v3838_v54  ;;  %v3877_v17 = vrot.slane %v3868_v2, 7 }
 0x21e   :  { %3210 = vmatprep.subr.bf16.mxu0 %v4656_v1  ;;  %2839 = vmatprep.subr.bf16.mxu1 %v4586_v5  ;;  %v5706_v1 = vsel %vm2939_vm0, %v3404_v53, %v3391_v45  ;;  %v4591_v5 = vcombine.low %v2520_v31, %v2523_v32  ;;  %v3861_v31 = vunpack.c.l.b16 %v3837_v3  ;;  %v3875_v32 = vrot.slane %v3867_v19, 7  ;;  %v2544_v3 = vld [vmem:[#allocation10 + $0x560] sm:$0xff]  ;;  %v2470_v19 = vld [vmem:[#allocation10 + $0x370] sm:$0xff] }
 0x21f   :  { %v5709_v6 = vsel %vm2939_vm0, %v3402_v59, %v3390_v58  ;;  %v2938_v24 = vunpack.c.l.b16 %v2500_v0  ;;  %v5714_v36 = vsel %vm2939_vm0, %v3877_v17, %v3862_v13  ;;  %v4630_v53 = vcombine.high %v2449_v38, %v2452_v39  ;;  %v2467_v17 = vld [vmem:[#allocation10 + $0x310] sm:$0xff] }
 0x220   :  { %v5717_v37 = vsel %vm2939_vm0, %v3875_v32, %v3861_v31  ;;  %v4629_v58 = vcombine.low %v2449_v38, %v2452_v39  ;;  %v4636_v0 = vcombine.high %v2455_v56, %v2458_v57  ;;  %v4648_v32 = vcombine.high %v2467_v17, %v2470_v19  ;;  %v2473_v38 = vld [vmem:[#allocation10 + $0x3d0] sm:$0xff] }
 0x221   :  { %v2476_v39 = vld [vmem:[#allocation10 + $0x430] sm:$0xff] }
 0x225   :  { %3211 = vmatpush1.bf16.xpose.msra.mxu0 %v4655_v30  ;;  %2840 = vmatpush1.bf16.xpose.msra.mxu1 %v4585_v27  ;;  %v4624_v27 = vcombine.high %v2443_v62, %v2446_v63  ;;  %v2933_v30 = vunpack.c.l.b16 %v2495_v61  ;;  %v2538_v61 = vld [vmem:[#allocation10 + $0x4a0] sm:$0xff]  ;;  %v2461_v62 = vld [vmem:[#allocation10 + $0x250] sm:$0xff] }
 0x226   :  { %3212 = vmatprep.subr.bf16.mxu0 %v4662_v34  ;;  %2841 = vmatprep.subr.bf16.mxu1 %v4592_v43  ;;  %v2932_v34 = vunpack.c.l.b16 %v2494_v55  ;;  %v2535_v43 = vld [vmem:[#allocation10 + $0x440] sm:$0xff]  ;;  %v2464_v63 = vld [vmem:[#allocation10 + $0x2b0] sm:$0xff] }
 0x227   :  { %v2940_v8 = vsel %vm2939_vm0, %v2933_v30, %v2927_v28  ;;  %v4604_v54 = vcombine.high %v2532_v41, %v2535_v43  ;;  %v2541_v55 = vld [vmem:[#allocation10 + $0x500] sm:$0xff]  ;;  %v4603_v59 = vcombine.low %v2532_v41, %v2535_v43  ;;  %v4642_v11 = vcombine.high %v2461_v62, %v2464_v63  ;;  %v2506_v28 = vld [vmem:[#allocation10 + $0x88] sm:$0xff] }
 0x228   :  { %v2945_v12 = vsel %vm2939_vm0, %v2938_v24, %v2932_v34  ;;  %v2946_v40 = vpack.c.b16 %v2940_v8, %v2940_v8  ;;  %v4610_v2 = vcombine.high %v2538_v61, %v2541_v55  ;;  %v4609_v9 = vcombine.low %v2538_v61, %v2541_v55  ;;  %v2512_v41 = vld [vmem:[#allocation10 + $0x148] sm:$0xff] }
 0x229   :  { %v2951_v45 = vpack.c.b16 %v2945_v12, %v2945_v12  ;;  %v4641_v30 = vcombine.low %v2461_v62, %v2464_v63  ;;  %v2301_v34 = vunpack.c.l.bf16 %v5611_v46  ;;  %v2307_v24 = vunpack.c.l.bf16 %v5613_v48 }
 0x22a   :  { %v4647_v43 = vcombine.low %v2467_v17, %v2470_v19  ;;  %v2551_v48 = vpack.c.bf16 %v5659_v4, %v5659_v4  ;;  %v4653_v62 = vcombine.low %v2473_v38, %v2476_v39  ;;  %v2485_v19 = vld [vmem:[#allocation10 + $0x550] sm:$0xff] }
 0x22b   :  { %v2333_v8 = vrot.slane %v2301_v34, 4  ;;  %v2369_v12 = vrot.slane %v2307_v24, 4 }
 0x22d   :  { %3213 = vmatpush1.bf16.xpose.msra.mxu0 %v4661_v7  ;;  %2842 = vmatpush1.bf16.xpose.msra.mxu1 %v4591_v5  ;;  %v2547_v5 = vld [vmem:[#allocation10 + $0x5c0] sm:$0xff]  ;;  %v4635_v7 = vcombine.low %v2455_v56, %v2458_v57  ;;  %v5727_v56 = vld [vmem:[#allocation10 + $0x68] sm:$0xff] }
 0x22e   :  { %3278 = vmatprep.subr.bf16.mxu0 %v4624_v27  ;;  %2843 = vmatprep.subr.bf16.mxu1 %v4598_v22  ;;  %v4616_v13 = vcombine.high %v2544_v3, %v2547_v5  ;;  %v2503_v27 = vld [vmem:[#allocation10 + $0x28] sm:$0xff]  ;;  %v4615_v31 = vcombine.low %v2544_v3, %v2547_v5 }
 0x22f   :  { %v4576_v22 = vcombine.high %v2503_v27, %v2506_v28  ;;  %v4575_v46 = vcombine.low %v2503_v27, %v2506_v28  ;;  %v2488_v27 = vld [vmem:[#allocation10 + $0x5b0] sm:$0xff] }
 0x234   :  { %3231 = vmatmul.mubr.bf16.vlgmr.msra.gmra.mrb[8].mxu0 %v2946_v40  ;;  %v2509_v40 = vld [vmem:[#allocation10 + $0xe8] sm:$0xff] }
 0x235   :  { %3279 = vmatpush1.bf16.xpose.msra.mxu0 %v4623_v44  ;;  %3310 = vmatprep.mubr.bf16.mxu0 %v2951_v45  ;;  %v2334_v44 = vmax.f32 %v2301_v34, %v2333_v8  ;;  %v2370_v45 = vmax.f32 %v2307_v24, %v2369_v12  ;;  %v2524_v34 = vld [vmem:[#allocation10 + $0x2c8] sm:$0xff] }
 0x236   :  { %2844 = vmatpush1.bf16.xpose.msra.mxu1 %v4597_v47  ;;  %3280 = vmatprep.subr.bf16.mxu0 %v4630_v53  ;;  %v4654_v47 = vcombine.high %v2473_v38, %v2476_v39  ;;  %v4582_v53 = vcombine.high %v2509_v40, %v2512_v41 }
 0x237   :  { %2845 = vmatprep.subr.bf16.mxu1 %v4604_v54  ;;  %v5725_v54 = vld [vmem:[#allocation10 + $0x8] sm:$0xff]  ;;  %v2335_v61 = vrot.slane %v2334_v44, 2  ;;  %v2371_v55 = vrot.slane %v2370_v45, 2 }
 0x238   :  { %v4621_v57 = vcombine.low %v5725_v54, %v5727_v56 }
 0x239   :  { %v2336_v63 = vmax.f32 %v2334_v44, %v2335_v61  ;;  %v2372_v3 = vmax.f32 %v2370_v45, %v2371_v55  ;;  %v3322_v44 = vld [vmem:[#allocation10 + $0x98] sm:$0xff] }
 0x23b   :  { %v2373_v17 = vrot.slane %v2372_v3, 1 }
 0x23d   :  { %3281 = vmatpush1.bf16.xpose.msra.mxu0 %v4629_v58  ;;  %v2479_v58 = vld [vmem:[#allocation10 + $0x490] sm:$0xff] }
 0x23e   :  { %2846 = vmatpush1.bf16.xpose.msra.mxu1 %v4603_v59  ;;  %3282 = vmatprep.subr.bf16.mxu0 %v4636_v0  ;;  %v2482_v59 = vld [vmem:[#allocation10 + $0x4f0] sm:$0xff]  ;;  %v2515_v0 = vld [vmem:[#allocation10 + $0x1a8] sm:$0xff] }
 0x23f   :  { %2847 = vmatprep.subr.bf16.mxu1 %v4610_v2  ;;  %v2518_v2 = vld [vmem:[#allocation10 + $0x208] sm:$0xff]  ;;  %v4660_v5 = vcombine.high %v2479_v58, %v2482_v59  ;;  %v4659_v24 = vcombine.low %v2479_v58, %v2482_v59 }
 0x240   :  { %v4587_v8 = vcombine.low %v2515_v0, %v2518_v2 }
 0x245   :  { %3283 = vmatpush1.bf16.xpose.msra.mxu0 %v4635_v7  ;;  %v4581_v7 = vcombine.low %v2509_v40, %v2512_v41 }
 0x246   :  { %2848 = vmatpush1.bf16.xpose.msra.mxu1 %v4609_v9  ;;  %3284 = vmatprep.subr.bf16.mxu0 %v4642_v11  ;;  %v4588_v9 = vcombine.high %v2515_v0, %v2518_v2  ;;  %v2414_v11 = vsub.f32 %v5673_v21, %v2390_v26  ;;  %v2408_v26 = vsub.f32 %v5667_v10, %v5626_v33 }
 0x247   :  { %2849 = vmatprep.subr.bf16.mxu1 %v4616_v13  ;;  %v2337_v13 = vrot.slane %v2336_v63, 1  ;;  %v4665_v33 = vcombine.low %v2485_v19, %v2488_v27 }
 0x248   :  { %v2426_v28 = vand.u32 2147483647, %v2414_v11  ;;  %v2420_v41 = vand.u32 2147483647, %v2408_v26  ;;  %v2536_v11 = vld [vmem:[#allocation10 + $0x448] sm:$0xff] }
 0x24a   :  { %v3375_v38 = vpack.c.bf16 %v2426_v28, %v2426_v28  ;;  %v3369_v55 = vpack.c.bf16 %v2420_v41, %v2420_v41  ;;  %v2545_v41 = vld [vmem:[#allocation10 + $0x568] sm:$0xff] }
 0x24c   :  { %v3399_v45 = vunpack.c.l.b16 %v3375_v38 }
 0x24d   :  { %3285 = vmatpush1.bf16.xpose.msra.mxu0 %v4641_v30  ;;  %v2521_v30 = vld [vmem:[#allocation10 + $0x268] sm:$0xff] }
 0x24e   :  { %2850 = vmatpush1.bf16.xpose.msra.mxu1 %v4615_v31  ;;  %3286 = vmatprep.subr.bf16.mxu0 %v4648_v32  ;;  %v5734_v31 = vmax.f32 %v2336_v63, %v2337_v13  ;;  %v5736_v32 = vmax.f32 %v2372_v3, %v2373_v17  ;;  %v4594_v12 = vcombine.high %v2521_v30, %v2524_v34  ;;  %v3408_v0 = vrot.slane %v3399_v45, 7  ;;  %v3325_v63 = vld [vmem:[#allocation10 + $0xf8] sm:$0xff] }
 0x24f   :  { %2875 = vmatprep.subr.bf16.mxu1 %v4576_v22  ;;  %v4666_v22 = vcombine.high %v2485_v19, %v2488_v27  ;;  %v4593_v58 = vcombine.low %v2521_v30, %v2524_v34  ;;  %v3328_v3 = vld [vmem:[#allocation10 + $0x158] sm:$0xff] }
 0x250   :  { %v2493_v39 = vpack.c.bf16 %v5734_v31, %v5734_v31  ;;  %v2499_v40 = vpack.c.bf16 %v5736_v32, %v5736_v32  ;;  %v4676_v17 = vcombine.high %v3325_v63, %v3328_v3  ;;  %v3331_v30 = vld [vmem:[#allocation10 + $0x1b8] sm:$0xff]  ;;  %v4675_v26 = vcombine.low %v3325_v63, %v3328_v3 }
 0x251   :  { %v3334_v34 = vld [vmem:[#allocation10 + $0x218] sm:$0xff] }
 0x252   :  { %v3355_v63 = vld [vmem:[#allocation10 + $0x4b8] sm:$0xff] }
 0x253   :  { %v3358_v3 = vld [vmem:[#allocation10 + $0x518] sm:$0xff] }
 0x255   :  { %2868 = vmatmul.mubr.bf16.vlgmr.msra.gmra.mrb[8].mxu1 %v2551_v48  ;;  %3287 = vmatpush1.bf16.xpose.msra.mxu0 %v4647_v43  ;;  %v3319_v43 = vld [vmem:[#allocation10 + $0x38] sm:$0xff]  ;;  %v2931_v48 = vunpack.c.l.b16 %v2493_v39 }
 0x256   :  { %3288 = vmatprep.subr.bf16.mxu0 %v4654_v47  ;;  %2876 = vmatpush1.bf16.xpose.msra.mxu1 %v4575_v46  ;;  %v2527_v47 = vld [vmem:[#allocation10 + $0x328] sm:$0xff]  ;;  %v4670_v61 = vcombine.high %v3319_v43, %v3322_v44  ;;  %v4669_v13 = vcombine.low %v3319_v43, %v3322_v44  ;;  %v3337_v39 = vld [vmem:[#allocation10 + $0x278] sm:$0xff]  ;;  %v4681_v44 = vcombine.low %v3331_v30, %v3334_v34 }
 0x257   :  { %2877 = vmatprep.subr.bf16.mxu1 %v4582_v53  ;;  %v2530_v46 = vld [vmem:[#allocation10 + $0x388] sm:$0xff]  ;;  %v2937_v53 = vunpack.c.l.b16 %v2499_v40  ;;  %v3340_v40 = vld [vmem:[#allocation10 + $0x2d8] sm:$0xff] }
 0x258   :  { %v4600_v59 = vcombine.high %v2527_v47, %v2530_v46  ;;  %v4599_v19 = vcombine.low %v2527_v47, %v2530_v46  ;;  %v2548_v43 = vld [vmem:[#allocation10 + $0x5c8] sm:$0xff]  ;;  %v4688_v45 = vcombine.high %v3337_v39, %v3340_v40 }
 0x259   :  { %v2944_v2 = vsel %vm2939_vm0, %v2937_v53, %v2931_v48  ;;  %v4618_v46 = vcombine.high %v2545_v41, %v2548_v43  ;;  %v3346_v48 = vld [vmem:[#allocation10 + $0x398] sm:$0xff]  ;;  %v4687_v53 = vcombine.low %v3337_v39, %v3340_v40 }
 0x25d   :  { %3289 = vmatpush1.bf16.xpose.msra.mxu0 %v4653_v62  ;;  %v3393_v62 = vunpack.c.l.b16 %v3369_v55  ;;  %v4617_v55 = vcombine.low %v2545_v41, %v2548_v43 }
 0x25e   :  { %3290 = vmatprep.subr.bf16.mxu0 %v4660_v5  ;;  %2878 = vmatpush1.bf16.xpose.msra.mxu1 %v4581_v7  ;;  %v2950_v5 = vpack.c.b16 %v2944_v2, %v2944_v2 }
 0x25f   :  { %2879 = vmatprep.subr.bf16.mxu1 %v4588_v9  ;;  %v3409_v7 = vsel %vm2939_vm0, %v3408_v0, %v3393_v62  ;;  %v2533_v9 = vld [vmem:[#allocation10 + $0x3e8] sm:$0xff]  ;;  %v3352_v0 = vld [vmem:[#allocation10 + $0x458] sm:$0xff] }
 0x260   :  { %v3417_v27 = vpack.c.b16 %v3409_v7, %v3409_v7  ;;  %v4606_v28 = vcombine.high %v2533_v9, %v2536_v11  ;;  %v4706_v7 = vcombine.high %v3355_v63, %v3358_v3 }
 0x265   :  { %3291 = vmatpush1.bf16.xpose.msra.mxu0 %v4659_v24  ;;  %v2539_v24 = vld [vmem:[#allocation10 + $0x4a8] sm:$0xff] }
 0x266   :  { %3292 = vmatprep.subr.bf16.mxu0 %v4666_v22  ;;  %2880 = vmatpush1.bf16.xpose.msra.mxu1 %v4587_v8  ;;  %v2542_v22 = vld [vmem:[#allocation10 + $0x508] sm:$0xff]  ;;  %v4682_v8 = vcombine.high %v3331_v30, %v3334_v34 }
 0x267   :  { %2881 = vmatprep.subr.bf16.mxu1 %v4594_v12  ;;  %v4605_v12 = vcombine.low %v2533_v9, %v2536_v11  ;;  %v4612_v38 = vcombine.high %v2539_v24, %v2542_v22  ;;  %v4611_v47 = vcombine.low %v2539_v24, %v2542_v22  ;;  %v2413_v9 = vsub.f32 %v5676_v23, %v2389_v18  ;;  %v3361_v11 = vld [vmem:[#allocation10 + $0x578] sm:$0xff] }
 0x268   :  { %v2430_v18 = vmul.f32 %v5624_v29, %v5590_v50 }
 0x26d   :  { %3293 = vmatpush1.bf16.xpose.msra.mxu0 %v4665_v33  ;;  %v3343_v33 = vld [vmem:[#allocation10 + $0x338] sm:$0xff] }
 0x26e   :  { %3706 = vmatprep.subr.bf16.mxu0 %v4670_v61  ;;  %2882 = vmatpush1.bf16.xpose.msra.mxu1 %v4593_v58  ;;  %v4694_v61 = vcombine.high %v3343_v33, %v3346_v48  ;;  %v4622_v58 = vcombine.high %v5725_v54, %v5727_v56  ;;  %v4693_v2 = vcombine.low %v3343_v33, %v3346_v48 }
 0x26f   :  { %2883 = vmatprep.subr.bf16.mxu1 %v4600_v59  ;;  %v3349_v59 = vld [vmem:[#allocation10 + $0x3f8] sm:$0xff] }
 0x270   :  { %v4700_v62 = vcombine.high %v3349_v59, %v3352_v0 }
 0x274   :  { %3311 = vmatmul.mubr.bf16.vlgmr.msra.gmra.mrb[12].mxu0 %v2950_v5  ;;  %v4699_v5 = vcombine.low %v3349_v59, %v3352_v0  ;;  %v410_v0 = vsub.s32 4, %v5540_v42 }
 0x275   :  { %3707 = vmatpush1.bf16.xpose.msra.mxu0 %v4669_v13  ;;  %3738 = vmatprep.mubr.bf16.mxu0 %v3417_v27  ;;  %v3364_v13 = vld [vmem:[#allocation10 + $0x5d8] sm:$0xff]  ;;  %v4705_v27 = vcombine.low %v3355_v63, %v3358_v3  ;;  %v3805_v63 = vld [vmem:[#allocation10 + $0x288] sm:$0xff] }
 0x276   :  { %3708 = vmatprep.subr.bf16.mxu0 %v4676_v17  ;;  %2884 = vmatpush1.bf16.xpose.msra.mxu1 %v4599_v19  ;;  %v2425_v17 = vand.u32 2147483647, %v2413_v9  ;;  %v2436_v19 = vmul.f32 %v2388_v60, %v5592_v51  ;;  %v4712_v30 = vcombine.high %v3361_v11, %v3364_v13  ;;  %v4711_v39 = vcombine.low %v3361_v11, %v3364_v13  ;;  %v3808_v3 = vld [vmem:[#allocation10 + $0x2e8] sm:$0xff] }
 0x277   :  { %2885 = vmatprep.subr.bf16.mxu1 %v4606_v28  ;;  %v2407_v28 = vsub.f32 %v5671_v14, %v5659_v4  ;;  %v3836_v60 = vpack.c.bf16 %v2430_v18, %v2430_v18  ;;  %v4734_v11 = vcombine.high %v3805_v63, %v3808_v3 }
 0x278   :  { %v3374_v34 = vpack.c.bf16 %v2425_v17, %v2425_v17  ;;  %v3842_v24 = vpack.c.bf16 %v2436_v19, %v2436_v19 }
 0x279   :  { %v2419_v22 = vand.u32 2147483647, %v2407_v28 }
 0x27b   :  { %v3368_v40 = vpack.c.bf16 %v2419_v22, %v2419_v22 }
 0x27d   :  { %3709 = vmatpush1.bf16.xpose.msra.mxu0 %v4675_v26  ;;  %v3398_v26 = vunpack.c.l.b16 %v3374_v34  ;;  %v3392_v4 = vunpack.c.l.b16 %v3368_v40  ;;  %v2492_v34 = vpack.c.bf16 %v5667_v10, %v5667_v10  ;;  %v3820_v40 = vld [vmem:[#allocation10 + $0x468] sm:$0xff] }
 0x27e   :  { %3710 = vmatprep.subr.bf16.mxu0 %v4682_v8  ;;  %2886 = vmatpush1.bf16.xpose.msra.mxu1 %v4605_v12  ;;  %v3787_v8 = vld [vmem:[#allocation10 + $0x48] sm:$0xff] }
 0x27f   :  { %2887 = vmatprep.subr.bf16.mxu1 %v4612_v38  ;;  %v3790_v12 = vld [vmem:[#allocation10 + $0xa8] sm:$0xff]  ;;  %v3866_v38 = vunpack.c.l.b16 %v3842_v24  ;;  %v3406_v41 = vrot.slane %v3398_v26, 7  ;;  %v4733_v24 = vcombine.low %v3805_v63, %v3808_v3  ;;  %v2930_v18 = vunpack.c.l.b16 %v2492_v34 }
 0x280   :  { %v4716_v51 = vcombine.high %v3787_v8, %v3790_v12  ;;  %v4715_v29 = vcombine.low %v3787_v8, %v3790_v12  ;;  %v2448_v8 = vld [vmem:[#allocation10 + $0xc8] sm:$0xff] }
 0x281   :  { %v3873_v43 = vrot.slane %v3866_v38, 7  ;;  %v2451_v38 = vld [vmem:[#allocation10 + $0x128] sm:$0xff] }
 0x282   :  { %v2463_v34 = vld [vmem:[#allocation10 + $0x2a8] sm:$0xff] }
 0x285   :  { %3711 = vmatpush1.bf16.xpose.msra.mxu0 %v4681_v44  ;;  %v3860_v44 = vunpack.c.l.b16 %v3836_v60 }
 0x286   :  { %3712 = vmatprep.subr.bf16.mxu0 %v4688_v45  ;;  %2888 = vmatpush1.bf16.xpose.msra.mxu1 %v4611_v47  ;;  %v3407_v45 = vsel %vm2939_vm0, %v3406_v41, %v3392_v4  ;;  %v3793_v47 = vld [vmem:[#allocation10 + $0x108] sm:$0xff] }
 0x287   :  { %2889 = vmatprep.subr.bf16.mxu1 %v4618_v46  ;;  %v3796_v46 = vld [vmem:[#allocation10 + $0x168] sm:$0xff]  ;;  %v3874_v50 = vsel %vm2939_vm0, %v3873_v43, %v3860_v44  ;;  %v3416_v33 = vpack.c.b16 %v3407_v45, %v3407_v45 }
 0x288   :  { %v4722_v48 = vcombine.high %v3793_v47, %v3796_v46 }
 0x28d   :  { %3713 = vmatpush1.bf16.xpose.msra.mxu0 %v4687_v53  ;;  %v3884_v53 = vpack.c.b16 %v3874_v50, %v3874_v50 }
 0x28e   :  { %3714 = vmatprep.subr.bf16.mxu0 %v4694_v61  ;;  %2890 = vmatpush1.bf16.xpose.msra.mxu1 %v4617_v55  ;;  %v3799_v61 = vld [vmem:[#allocation10 + $0x1c8] sm:$0xff] }
 0x28f   :  { %3238 = vmatprep.subr.bf16.mxu1 %v4622_v58  ;;  %v3802_v55 = vld [vmem:[#allocation10 + $0x228] sm:$0xff]  ;;  %v4721_v58 = vcombine.low %v3793_v47, %v3796_v46  ;;  %v4628_v47 = vcombine.high %v2448_v8, %v2451_v38 }
 0x290   :  { %v4728_v59 = vcombine.high %v3799_v61, %v3802_v55 }
 0x295   :  { %3715 = vmatpush1.bf16.xpose.msra.mxu0 %v4693_v2  ;;  %v414_v2 = vsub.s32 5, %v5540_v42  ;;  %v3811_v42 = vld [vmem:[#allocation10 + $0x348] sm:$0xff] }
 0x296   :  { %3716 = vmatprep.subr.bf16.mxu0 %v4700_v62  ;;  %v411_v62 = vrot.slane %v5601_v15, %v410_v0  ;;  %v3823_v0 = vld [vmem:[#allocation10 + $0x4c8] sm:$0xff] }
 0x29d   :  { %3717 = vmatpush1.bf16.xpose.msra.mxu0 %v4699_v5  ;;  %v415_v5 = vrot.slane %v5601_v15, %v414_v2  ;;  %v2498_v15 = vpack.c.bf16 %v5673_v21, %v5673_v21  ;;  %v3826_v2 = vld [vmem:[#allocation10 + $0x528] sm:$0xff] }
 0x29e   :  { %3718 = vmatprep.subr.bf16.mxu0 %v4706_v7  ;;  %v4727_v7 = vcombine.low %v3799_v61, %v3802_v55  ;;  %v2454_v55 = vld [vmem:[#allocation10 + $0x188] sm:$0xff] }
 0x29f   :  { %v2936_v26 = vunpack.c.l.b16 %v2498_v15  ;;  %v3829_v15 = vld [vmem:[#allocation10 + $0x588] sm:$0xff] }
 0x2a1   :  { %v2943_v60 = vsel %vm2939_vm0, %v2936_v26, %v2930_v18  ;;  %v4751_v26 = vcombine.low %v3823_v0, %v3826_v2 }
 0x2a5   :  { %3719 = vmatpush1.bf16.xpose.msra.mxu0 %v4705_v27 }
 0x2a6   :  { %3720 = vmatprep.subr.bf16.mxu0 %v4712_v30  ;;  %v3814_v30 = vld [vmem:[#allocation10 + $0x3a8] sm:$0xff] }
 0x2a7   :  { %v4740_v22 = vcombine.high %v3811_v42, %v3814_v30  ;;  %v4739_v43 = vcombine.low %v3811_v42, %v3814_v30  ;;  %v2460_v42 = vld [vmem:[#allocation10 + $0x248] sm:$0xff] }
 0x2ad   :  { %3721 = vmatpush1.bf16.xpose.msra.mxu0 %v4711_v39  ;;  %v3817_v39 = vld [vmem:[#allocation10 + $0x408] sm:$0xff] }
 0x2ae   :  { %4135 = vmatprep.subr.bf16.mxu0 %v4716_v51  ;;  %v4746_v46 = vcombine.high %v3817_v39, %v3820_v40 }
 0x2b4   :  { %3739 = vmatmul.mubr.bf16.vlgmr.msra.gmra.mrb[16].mxu0 %v3416_v33 }
 0x2b5   :  { %4136 = vmatpush1.bf16.xpose.msra.mxu0 %v4715_v29  ;;  %4167 = vmatprep.mubr.bf16.mxu0 %v3884_v53  ;;  %v2949_v29 = vpack.c.b16 %v2943_v60, %v2943_v60  ;;  %v2429_v60 = vmul.f32 %v5620_v20, %v5636_v25 }
 0x2b6   :  { %4137 = vmatprep.subr.bf16.mxu0 %v4722_v48 }
 0x2bd   :  { %4138 = vmatpush1.bf16.xpose.msra.mxu0 %v4721_v58 }
 0x2be   :  { %4139 = vmatprep.subr.bf16.mxu0 %v4728_v59  ;;  %v2457_v59 = vld [vmem:[#allocation10 + $0x1e8] sm:$0xff] }
 0x2bf   :  { %v4633_v18 = vcombine.low %v2454_v55, %v2457_v59 }
 0x2c2   :  { %v2278_v9 = vpop.f32.mrb[4].mxu0 }
 0x2c3   :  { %v4768_v13 = vadd.f32 %v2278_v9, %v411_v62  ;;  %v2280_v17 = vpop.f32.mrb[5].mxu0  ;;  %v4745_v9 = vcombine.low %v3817_v39, %v3820_v40 }
 0x2c4   :  { %v4769_v19 = vadd.f32 %v2280_v17, %v415_v5  ;;  %v2282_v27 = vpop.f32.mrb[6].mxu0  ;;  %v4752_v17 = vcombine.high %v3823_v0, %v3826_v2  ;;  %v2475_v0 = vld [vmem:[#allocation10 + $0x428] sm:$0xff]  ;;  %v3795_v2 = vld [vmem:[#allocation10 + $0x118] sm:$0xff] }
 0x2c5   :  { %5247 = vtanh.f32 %v4768_v13  ;;  %v2283_v28 = vpop.f32.mrb[7].mxu0  ;;  %4140 = vmatpush1.bf16.xpose.msra.mxu0 %v4727_v7  ;;  %v4627_v7 = vcombine.low %v2448_v8, %v2451_v38  ;;  %v4634_v13 = vcombine.high %v2454_v55, %v2457_v59  ;;  %v4640_v38 = vcombine.high %v2460_v42, %v2463_v34  ;;  %v2472_v59 = vld [vmem:[#allocation10 + $0x3c8] sm:$0xff] }
 0x2c6   :  { %5249 = vtanh.f32 %v4769_v19  ;;  %4141 = vmatprep.subr.bf16.mxu0 %v4734_v11 }
 0x2cd   :  { %4142 = vmatpush1.bf16.xpose.msra.mxu0 %v4733_v24  ;;  %v3832_v24 = vld [vmem:[#allocation10 + $0x5e8] sm:$0xff] }
 0x2ce   :  { %4143 = vmatprep.subr.bf16.mxu0 %v4740_v22  ;;  %v2435_v22 = vmul.f32 %v2387_v52, %v5644_v49  ;;  %v4758_v39 = vcombine.high %v3829_v15, %v3832_v24  ;;  %v3792_v49 = vld [vmem:[#allocation10 + $0xb8] sm:$0xff] }
 0x2cf   :  { %v5768_v12 = vpop.eup %5247 }
 0x2d0   :  { %v5770_v51 = vpop.eup %5249  ;;  %v2391_v10 = vrot.slane %v5768_v12, 1  ;;  %v2409_v21 = vsub.f32 %v5734_v31, %v5768_v12  ;;  %v2553_v45 = vpack.c.bf16 %v5768_v12, %v5768_v12  ;;  %v3841_v40 = vpack.c.bf16 %v2435_v22, %v2435_v22  ;;  %v3807_v22 = vld [vmem:[#allocation10 + $0x298] sm:$0xff] }
 0x2d1   :  { %v2554_v41 = vpack.c.bf16 %v5770_v51, %v5770_v51  ;;  %v2392_v4 = vrot.slane %v5770_v51, 1  ;;  %v2410_v44 = vsub.f32 %v5683_v16, %v5770_v51  ;;  %v2434_v52 = vmul.f32 %v5770_v51, %v5683_v16 }
 0x2d2   :  { %v2415_v50 = vsub.f32 %v5736_v32, %v2391_v10  ;;  %v2421_v48 = vand.u32 2147483647, %v2409_v21 }
 0x2d3   :  { %2907 = vmatprep.mubr.bf16.mxu1 %v2554_v41  ;;  %v2416_v33 = vsub.f32 %v5685_v35, %v2392_v4  ;;  %v2422_v53 = vand.u32 2147483647, %v2410_v44  ;;  %v2440_v8 = vmul.f32 %v2392_v4, %v5685_v35  ;;  %v2466_v41 = vld [vmem:[#allocation10 + $0x308] sm:$0xff]  ;;  %v3865_v44 = vunpack.c.l.b16 %v3841_v40 }
 0x2d4   :  { %2908 = vmatmul.mubr.bf16.vlgmr.msra.gmra.mrb[12].mxu1 %v2553_v45  ;;  %v2427_v61 = vand.u32 2147483647, %v2415_v50  ;;  %v3370_v62 = vpack.c.bf16 %v2421_v48, %v2421_v48  ;;  %v3789_v45 = vld [vmem:[#allocation10 + $0x58] sm:$0xff]  ;;  %v3835_v50 = vpack.c.bf16 %v2429_v60, %v2429_v60  ;;  %v2491_v40 = vpack.c.bf16 %v5671_v14, %v5671_v14 }
 0x2d5   :  { %3239 = vmatpush1.bf16.xpose.msra.mxu1 %v4621_v57  ;;  %4144 = vmatpush1.bf16.xpose.msra.mxu0 %v4739_v43  ;;  %v2428_v58 = vand.u32 2147483647, %v2416_v33  ;;  %v3371_v3 = vpack.c.bf16 %v2422_v53, %v2422_v53  ;;  %v3846_v21 = vpack.c.bf16 %v2440_v8, %v2440_v8  ;;  %v2469_v43 = vld [vmem:[#allocation10 + $0x368] sm:$0xff]  ;;  %v4720_v25 = vcombine.high %v3789_v45, %v3792_v49 }
 0x2d6   :  { %3240 = vmatprep.subr.bf16.mxu1 %v4628_v47  ;;  %4145 = vmatprep.subr.bf16.mxu0 %v4746_v46  ;;  %v3376_v63 = vpack.c.bf16 %v2427_v61, %v2427_v61  ;;  %v3394_v56 = vunpack.c.l.b16 %v3370_v62  ;;  %v4639_v47 = vcombine.low %v2460_v42, %v2463_v34  ;;  %v4757_v46 = vcombine.low %v3829_v15, %v3832_v24  ;;  %v3798_v62 = vld [vmem:[#allocation10 + $0x178] sm:$0xff]  ;;  %v2484_v15 = vld [vmem:[#allocation10 + $0x548] sm:$0xff] }
 0x2d7   :  { %3270 = vmatprep.mubr.bf16.mxu1 %v2949_v29  ;;  %v3377_v5 = vpack.c.bf16 %v2428_v58, %v2428_v58  ;;  %v3395_v19 = vunpack.c.l.b16 %v3371_v3  ;;  %v3870_v29 = vunpack.c.l.b16 %v3846_v21  ;;  %v4646_v20 = vcombine.high %v2466_v41, %v2469_v43  ;;  %v2487_v24 = vld [vmem:[#allocation10 + $0x5a8] sm:$0xff]  ;;  %v3318_v21 = vld [vmem:[#allocation10 + $0x30] sm:$0xff] }
 0x2d8   :  { %v3400_v11 = vunpack.c.l.b16 %v3376_v63  ;;  %v3871_v53 = vrot.slane %v3865_v44, 7  ;;  %v3840_v61 = vpack.c.bf16 %v2434_v52, %v2434_v52  ;;  %v3859_v55 = vunpack.c.l.b16 %v3835_v50  ;;  %v3816_v44 = vld [vmem:[#allocation10 + $0x3b8] sm:$0xff] }
 0x2d9   :  { %v3401_v54 = vunpack.c.l.b16 %v3377_v5  ;;  %v3881_v58 = vrot.slane %v3870_v29, 7  ;;  %v4645_v63 = vcombine.low %v2466_v41, %v2469_v43  ;;  %v4719_v3 = vcombine.low %v3789_v45, %v3792_v49  ;;  %v3321_v41 = vld [vmem:[#allocation10 + $0x90] sm:$0xff]  ;;  %v3813_v43 = vld [vmem:[#allocation10 + $0x358] sm:$0xff] }
 0x2da   :  { %v3410_v57 = vrot.slane %v3400_v11, 7  ;;  %v3872_v16 = vsel %vm2939_vm0, %v3871_v53, %v3859_v55  ;;  %v3864_v51 = vunpack.c.l.b16 %v3840_v61  ;;  %v4726_v11 = vcombine.high %v3795_v2, %v3798_v62  ;;  %v3819_v53 = vld [vmem:[#allocation10 + $0x418] sm:$0xff] }
 0x2db   :  { %v3412_v27 = vrot.slane %v3401_v54, 7  ;;  %v2481_v54 = vld [vmem:[#allocation10 + $0x4e8] sm:$0xff]  ;;  %v2497_v60 = vpack.c.bf16 %v5676_v23, %v5676_v23  ;;  %v4663_v52 = vcombine.low %v2484_v15, %v2487_v24  ;;  %v4668_v29 = vcombine.high %v3318_v21, %v3321_v41  ;;  %v3822_v61 = vld [vmem:[#allocation10 + $0x478] sm:$0xff] }
 0x2dc   :  { %v5791_v28 = vsel %vm2939_vm0, %v3410_v57, %v3394_v56  ;;  %v3882_v5 = vsel %vm2939_vm0, %v3881_v58, %v3864_v51  ;;  %v3801_v56 = vld [vmem:[#allocation10 + $0x1d8] sm:$0xff]  ;;  %v4667_v55 = vcombine.low %v3318_v21, %v3321_v41  ;;  %v4743_v58 = vcombine.low %v3813_v43, %v3816_v44  ;;  %v3351_v41 = vld [vmem:[#allocation10 + $0x450] sm:$0xff] }
 0x2dd   :  { %3241 = vmatpush1.bf16.xpose.msra.mxu1 %v4627_v7  ;;  %4146 = vmatpush1.bf16.xpose.msra.mxu0 %v4745_v9  ;;  %v5794_v30 = vsel %vm2939_vm0, %v3412_v27, %v3395_v19  ;;  %v3883_v7 = vpack.c.b16 %v3872_v16, %v3872_v16  ;;  %v4652_v9 = vcombine.high %v2472_v59, %v2475_v0  ;;  %v3804_v57 = vld [vmem:[#allocation10 + $0x238] sm:$0xff] }
 0x2de   :  { %3242 = vmatprep.subr.bf16.mxu1 %v4634_v13  ;;  %4147 = vmatprep.subr.bf16.mxu0 %v4752_v17  ;;  %v3888_v13 = vpack.c.b16 %v3882_v5, %v3882_v5  ;;  %v2478_v17 = vld [vmem:[#allocation10 + $0x488] sm:$0xff]  ;;  %v4651_v19 = vcombine.low %v2472_v59, %v2475_v0  ;;  %v4725_v27 = vcombine.low %v3795_v2, %v3798_v62  ;;  %v3330_v0 = vld [vmem:[#allocation10 + $0x1b0] sm:$0xff]  ;;  %v3825_v62 = vld [vmem:[#allocation10 + $0x4d8] sm:$0xff] }
 0x2df   :  { %v4658_v42 = vcombine.high %v2478_v17, %v2481_v54  ;;  %v4732_v34 = vcombine.high %v3801_v56, %v3804_v57  ;;  %v4731_v8 = vcombine.low %v3801_v56, %v3804_v57  ;;  %v3415_v51 = vpack.c.b16 %v5706_v1, %v5706_v1  ;;  %v3333_v2 = vld [vmem:[#allocation10 + $0x210] sm:$0xff] }
 0x2e0   :  { %v4750_v59 = vcombine.high %v3819_v53, %v3822_v61  ;;  %v4749_v5 = vcombine.low %v3819_v53, %v3822_v61  ;;  %v3336_v1 = vld [vmem:[#allocation10 + $0x270] sm:$0xff]  ;;  %v4679_v56 = vcombine.low %v3330_v0, %v3333_v2 }
 0x2e5   :  { %3243 = vmatpush1.bf16.xpose.msra.mxu1 %v4633_v18  ;;  %4148 = vmatpush1.bf16.xpose.msra.mxu0 %v4751_v26  ;;  %v3810_v18 = vld [vmem:[#allocation10 + $0x2f8] sm:$0xff]  ;;  %v4657_v26 = vcombine.low %v2478_v17, %v2481_v54  ;;  %v2439_v54 = vmul.f32 %v2391_v10, %v5736_v32 }
 0x2e6   :  { %3244 = vmatprep.subr.bf16.mxu1 %v4640_v38  ;;  %4149 = vmatprep.subr.bf16.mxu0 %v4758_v39  ;;  %v4664_v38 = vcombine.high %v2484_v15, %v2487_v24  ;;  %v4738_v39 = vcombine.high %v3807_v22, %v3810_v18  ;;  %v3834_v17 = vld [vmem:[#allocation10 + $0x5f8] sm:$0xff]  ;;  %v3342_v15 = vld [vmem:[#allocation10 + $0x330] sm:$0xff] }
 0x2e7   :  { %v5804_v35 = vpop.f32.mrb[4].mxu1  ;;  %v3345_v24 = vld [vmem:[#allocation10 + $0x390] sm:$0xff] }
 0x2e8   :  { %v2831_v4 = vpop.f32.mrb[5].mxu1 }
 0x2e9   :  { %v2832_v33 = vpop.f32.mrb[6].mxu1  ;;  %v4737_v4 = vcombine.low %v3807_v22, %v3810_v18 }
 0x2ea   :  { %v2833_v48 = vpop.f32.mrb[7].mxu1  ;;  %v4744_v33 = vcombine.high %v3813_v43, %v3816_v44  ;;  %v4691_v44 = vcombine.low %v3342_v15, %v3345_v24 }
 0x2ed   :  { %3245 = vmatpush1.bf16.xpose.msra.mxu1 %v4639_v47  ;;  %4150 = vmatpush1.bf16.xpose.msra.mxu0 %v4757_v46  ;;  %v2929_v47 = vunpack.c.l.b16 %v2491_v40  ;;  %v2935_v46 = vunpack.c.l.b16 %v2497_v60 }
 0x2ee   :  { %3246 = vmatprep.subr.bf16.mxu1 %v4646_v20  ;;  %4215 = vmatprep.subr.bf16.mxu0 %v4720_v25  ;;  %v3324_v20 = vld [vmem:[#allocation10 + $0xf0] sm:$0xff] }
 0x2ef   :  { %v2942_v23 = vsel %vm2939_vm0, %v2935_v46, %v2929_v47  ;;  %v3327_v25 = vld [vmem:[#allocation10 + $0x150] sm:$0xff] }
 0x2f0   :  { %v2948_v48 = vpack.c.b16 %v2942_v23, %v2942_v23  ;;  %v4674_v16 = vcombine.high %v3324_v20, %v3327_v25  ;;  %v3320_v23 = vld [vmem:[#allocation10 + $0x40] sm:$0xff] }
 0x2f4   :  { %4168 = vmatmul.mubr.bf16.vlgmr.msra.gmra.mrb[20].mxu0 %v3883_v7  ;;  %v4680_v7 = vcombine.high %v3330_v0, %v3333_v2  ;;  %v3414_v0 = vpack.c.b16 %v5709_v6, %v5709_v6  ;;  %v3344_v6 = vld [vmem:[#allocation10 + $0x340] sm:$0xff] }
 0x2f5   :  { %3247 = vmatpush1.bf16.xpose.msra.mxu1 %v4645_v63  ;;  %4216 = vmatpush1.bf16.xpose.msra.mxu0 %v4719_v3  ;;  %v3828_v63 = vld [vmem:[#allocation10 + $0x538] sm:$0xff]  ;;  %v4673_v3 = vcombine.low %v3324_v20, %v3327_v25  ;;  %v3323_v20 = vld [vmem:[#allocation10 + $0xa0] sm:$0xff] }
 0x2f6   :  { %4247 = vmatprep.mubr.bf16.mxu0 %v3888_v13  ;;  %3248 = vmatprep.subr.bf16.mxu1 %v4652_v9  ;;  %v4756_v9 = vcombine.high %v3825_v62, %v3828_v63  ;;  %v3831_v13 = vld [vmem:[#allocation10 + $0x598] sm:$0xff]  ;;  %v4755_v57 = vcombine.low %v3825_v62, %v3828_v63  ;;  %v3419_v62 = vpack.c.b16 %v5794_v30, %v5794_v30  ;;  %v3332_v63 = vld [vmem:[#allocation10 + $0x1c0] sm:$0xff] }
 0x2f7   :  { %4217 = vmatprep.subr.bf16.mxu0 %v4726_v11  ;;  %v3339_v11 = vld [vmem:[#allocation10 + $0x2d0] sm:$0xff] }
 0x2f8   :  { %v4685_v10 = vcombine.low %v3336_v1, %v3339_v11 }
 0x2fd   :  { %3249 = vmatpush1.bf16.xpose.msra.mxu1 %v4651_v19  ;;  %4218 = vmatpush1.bf16.xpose.msra.mxu0 %v4725_v27  ;;  %v4686_v19 = vcombine.high %v3336_v1, %v3339_v11  ;;  %v4762_v27 = vcombine.high %v3831_v13, %v3834_v17  ;;  %v3341_v1 = vld [vmem:[#allocation10 + $0x2e0] sm:$0xff] }
 0x2fe   :  { %3250 = vmatprep.subr.bf16.mxu1 %v4658_v42  ;;  %4219 = vmatprep.subr.bf16.mxu0 %v4732_v34  ;;  %v3845_v42 = vpack.c.bf16 %v2439_v54, %v2439_v54  ;;  %v2433_v34 = vmul.f32 %v5768_v12, %v5734_v31  ;;  %v3348_v12 = vld [vmem:[#allocation10 + $0x3f0] sm:$0xff] }
 0x2ff   :  { %v4697_v47 = vcombine.low %v3348_v12, %v3351_v41 }
 0x300   :  { %v3869_v18 = vunpack.c.l.b16 %v3845_v42  ;;  %v3839_v40 = vpack.c.bf16 %v2433_v34, %v2433_v34  ;;  %v3356_v42 = vld [vmem:[#allocation10 + $0x4c0] sm:$0xff] }
 0x301   :  { %v3359_v34 = vld [vmem:[#allocation10 + $0x520] sm:$0xff] }
 0x302   :  { %v3879_v21 = vrot.slane %v3869_v18, 7  ;;  %v3863_v31 = vunpack.c.l.b16 %v3839_v40  ;;  %v3365_v18 = vld [vmem:[#allocation10 + $0x5e0] sm:$0xff] }
 0x304   :  { %v3880_v43 = vsel %vm2939_vm0, %v3879_v21, %v3863_v31 }
 0x305   :  { %3251 = vmatpush1.bf16.xpose.msra.mxu1 %v4657_v26  ;;  %4220 = vmatpush1.bf16.xpose.msra.mxu0 %v4731_v8 }
 0x306   :  { %3252 = vmatprep.subr.bf16.mxu1 %v4664_v38  ;;  %4221 = vmatprep.subr.bf16.mxu0 %v4738_v39  ;;  %v4761_v38 = vcombine.low %v3831_v13, %v3834_v17  ;;  %v4692_v39 = vcombine.high %v3342_v15, %v3345_v24  ;;  %v3347_v17 = vld [vmem:[#allocation10 + $0x3a0] sm:$0xff]  ;;  %v4708_v24 = vcombine.high %v3356_v42, %v3359_v34 }
 0x307   :  { %v5812_v45 = vpop.f32.mrb[8].mxu0  ;;  %v4696_v30 = vcombine.high %v3344_v6, %v3347_v17 }
 0x308   :  { %v3234_v49 = vpop.f32.mrb[9].mxu0 }
 0x309   :  { %v3235_v50 = vpop.f32.mrb[10].mxu0  ;;  %v4698_v49 = vcombine.high %v3348_v12, %v3351_v41  ;;  %v3794_v41 = vld [vmem:[#allocation10 + $0x110] sm:$0xff] }
 0x30a   :  { %v3236_v14 = vpop.f32.mrb[11].mxu0  ;;  %v3360_v50 = vld [vmem:[#allocation10 + $0x570] sm:$0xff] }
 0x30d   :  { %3253 = vmatpush1.bf16.xpose.msra.mxu1 %v4663_v52  ;;  %4222 = vmatpush1.bf16.xpose.msra.mxu0 %v4737_v4  ;;  %v3354_v52 = vld [vmem:[#allocation10 + $0x4b0] sm:$0xff] }
 0x30e   :  { %3666 = vmatprep.subr.bf16.mxu1 %v4668_v29  ;;  %4223 = vmatprep.subr.bf16.mxu0 %v4744_v33  ;;  %v3357_v4 = vld [vmem:[#allocation10 + $0x510] sm:$0xff] }
 0x30f   :  { %v4704_v46 = vcombine.high %v3354_v52, %v3357_v4  ;;  %v3363_v29 = vld [vmem:[#allocation10 + $0x5d0] sm:$0xff]  ;;  %v4703_v33 = vcombine.low %v3354_v52, %v3357_v4  ;;  %v3886_v52 = vpack.c.b16 %v5714_v36, %v5714_v36 }
 0x310   :  { %v4710_v14 = vcombine.high %v3360_v50, %v3363_v29  ;;  %v4709_v53 = vcombine.low %v3360_v50, %v3363_v29  ;;  %v3800_v4 = vld [vmem:[#allocation10 + $0x1d0] sm:$0xff] }
 0x311   :  { %v3806_v29 = vld [vmem:[#allocation10 + $0x290] sm:$0xff] }
 0x314   :  { %3271 = vmatmul.mubr.bf16.vlgmr.msra.gmra.mrb[16].mxu1 %v2948_v48 }
 0x315   :  { %3667 = vmatpush1.bf16.xpose.msra.mxu1 %v4667_v55  ;;  %3698 = vmatprep.mubr.bf16.mxu1 %v3415_v51  ;;  %v4672_v55 = vcombine.high %v3320_v23, %v3323_v20  ;;  %v3329_v51 = vld [vmem:[#allocation10 + $0x160] sm:$0xff] }
 0x316   :  { %4224 = vmatpush1.bf16.xpose.msra.mxu0 %v4743_v58  ;;  %3668 = vmatprep.subr.bf16.mxu1 %v4674_v16  ;;  %v3326_v16 = vld [vmem:[#allocation10 + $0x100] sm:$0xff] }
 0x317   :  { %4225 = vmatprep.subr.bf16.mxu0 %v4750_v59  ;;  %v4671_v59 = vcombine.low %v3320_v23, %v3323_v20  ;;  %v4678_v2 = vcombine.high %v3326_v16, %v3329_v51  ;;  %v3812_v20 = vld [vmem:[#allocation10 + $0x350] sm:$0xff] }
 0x31d   :  { %3669 = vmatpush1.bf16.xpose.msra.mxu1 %v4673_v3  ;;  %v3335_v3 = vld [vmem:[#allocation10 + $0x220] sm:$0xff] }
 0x31e   :  { %4226 = vmatpush1.bf16.xpose.msra.mxu0 %v4749_v5  ;;  %3670 = vmatprep.subr.bf16.mxu1 %v4680_v7  ;;  %v4677_v5 = vcombine.low %v3326_v16, %v3329_v51  ;;  %v4684_v7 = vcombine.high %v3332_v63, %v3335_v3  ;;  %v4683_v11 = vcombine.low %v3332_v63, %v3335_v3  ;;  %v3824_v63 = vld [vmem:[#allocation10 + $0x4d0] sm:$0xff] }
 0x31f   :  { %4227 = vmatprep.subr.bf16.mxu0 %v4756_v9  ;;  %v3338_v9 = vld [vmem:[#allocation10 + $0x280] sm:$0xff]  ;;  %v3827_v3 = vld [vmem:[#allocation10 + $0x530] sm:$0xff] }
 0x320   :  { %v4690_v13 = vcombine.high %v3338_v9, %v3341_v1  ;;  %v4689_v54 = vcombine.low %v3338_v9, %v3341_v1  ;;  %v3833_v9 = vld [vmem:[#allocation10 + $0x5f0] sm:$0xff]  ;;  %v4753_v1 = vcombine.low %v3824_v63, %v3827_v3 }
 0x325   :  { %3671 = vmatpush1.bf16.xpose.msra.mxu1 %v4679_v56  ;;  %v3350_v56 = vld [vmem:[#allocation10 + $0x400] sm:$0xff] }
 0x326   :  { %4228 = vmatpush1.bf16.xpose.msra.mxu0 %v4755_v57  ;;  %3672 = vmatprep.subr.bf16.mxu1 %v4686_v19  ;;  %v3353_v57 = vld [vmem:[#allocation10 + $0x460] sm:$0xff]  ;;  %v4695_v19 = vcombine.low %v3344_v6, %v3347_v17 }
 0x327   :  { %4229 = vmatprep.subr.bf16.mxu0 %v4762_v27  ;;  %v4702_v27 = vcombine.high %v3350_v56, %v3353_v57  ;;  %v4701_v15 = vcombine.low %v3350_v56, %v3353_v57 }
 0x328   :  { %v2869_v22 = vpop.f32.mrb[8].mxu1 }
 0x329   :  { %v5823_v26 = vadd.f32 %v2869_v22, %v5804_v35  ;;  %v2871_v32 = vpop.f32.mrb[9].mxu1  ;;  %v3887_v35 = vpack.c.b16 %v3880_v43, %v3880_v43  ;;  %v3362_v22 = vld [vmem:[#allocation10 + $0x580] sm:$0xff]  ;;  %v3797_v43 = vld [vmem:[#allocation10 + $0x170] sm:$0xff] }
 0x32a   :  { %v2872_v8 = vpop.f32.mrb[10].mxu1  ;;  %v4707_v32 = vcombine.low %v3356_v42, %v3359_v34  ;;  %v4713_v21 = vcombine.low %v3362_v22, %v3365_v18 }
 0x32b   :  { %v2873_v60 = vpop.f32.mrb[11].mxu1 }
 0x32d   :  { %3673 = vmatpush1.bf16.xpose.msra.mxu1 %v4685_v10  ;;  %v4714_v10 = vcombine.high %v3362_v22, %v3365_v18 }
 0x32e   :  { %4230 = vmatpush1.bf16.xpose.msra.mxu0 %v4761_v38  ;;  %3674 = vmatprep.subr.bf16.mxu1 %v4692_v39  ;;  %v3788_v38 = vld [vmem:[#allocation10 + $0x50] sm:$0xff] }
 0x32f   :  { %v3791_v39 = vld [vmem:[#allocation10 + $0xb0] sm:$0xff] }
 0x330   :  { %v4718_v12 = vcombine.high %v3788_v38, %v3791_v39 }
 0x335   :  { %3675 = vmatpush1.bf16.xpose.msra.mxu1 %v4691_v44  ;;  %4248 = vmatmul.mubr.bf16.vlgmr.msra.gmra.mrb[24].mxu0 %v3887_v35  ;;  %v4717_v44 = vcombine.low %v3788_v38, %v3791_v39  ;;  %v4724_v35 = vcombine.high %v3794_v41, %v3797_v43 }
 0x336   :  { %3676 = vmatprep.subr.bf16.mxu1 %v4698_v49  ;;  %v3418_v49 = vpack.c.b16 %v5791_v28, %v5791_v28 }
 0x33d   :  { %3677 = vmatpush1.bf16.xpose.msra.mxu1 %v4697_v47  ;;  %v3803_v47 = vld [vmem:[#allocation10 + $0x230] sm:$0xff] }
 0x33e   :  { %3678 = vmatprep.subr.bf16.mxu1 %v4704_v46  ;;  %v4723_v46 = vcombine.low %v3794_v41, %v3797_v43  ;;  %v4730_v50 = vcombine.high %v3800_v4, %v3803_v47 }
 0x345   :  { %3679 = vmatpush1.bf16.xpose.msra.mxu1 %v4703_v33  ;;  %v3809_v33 = vld [vmem:[#allocation10 + $0x2f0] sm:$0xff] }
 0x346   :  { %3680 = vmatprep.subr.bf16.mxu1 %v4710_v14  ;;  %v4729_v14 = vcombine.low %v3800_v4, %v3803_v47  ;;  %v4736_v23 = vcombine.high %v3806_v29, %v3809_v33  ;;  %v4763_v4 = vld [vmem:[#allocation11] ss:$0 sm:$0xff] }
 0x347   :  { %v5826_v25 = vpop.f32.mrb[12].mxu0 }
 0x348   :  { %v3314_v48 = vpop.f32.mrb[13].mxu0 }
 0x349   :  { %v3315_v61 = vpop.f32.mrb[14].mxu0  ;;  %v3815_v48 = vld [vmem:[#allocation10 + $0x3b0] sm:$0xff] }
 0x34a   :  { %v3316_v58 = vpop.f32.mrb[15].mxu0  ;;  %v4742_v16 = vcombine.high %v3812_v20, %v3815_v48 }
 0x34d   :  { %3681 = vmatpush1.bf16.xpose.msra.mxu1 %v4709_v53 }
 0x34e   :  { %3746 = vmatprep.subr.bf16.mxu1 %v4672_v55  ;;  %v4735_v55 = vcombine.low %v3806_v29, %v3809_v33 }
 0x354   :  { %3699 = vmatmul.mubr.bf16.vlgmr.msra.gmra.mrb[20].mxu1 %v3414_v0  ;;  %v3821_v0 = vld [vmem:[#allocation10 + $0x470] sm:$0xff] }
 0x355   :  { %3747 = vmatpush1.bf16.xpose.msra.mxu1 %v4671_v59  ;;  %3778 = vmatprep.mubr.bf16.mxu1 %v3419_v62  ;;  %v3818_v59 = vld [vmem:[#allocation10 + $0x410] sm:$0xff] }
 0x356   :  { %3748 = vmatprep.subr.bf16.mxu1 %v4678_v2  ;;  %v4741_v2 = vcombine.low %v3812_v20, %v3815_v48  ;;  %v4748_v62 = vcombine.high %v3818_v59, %v3821_v0 }
 0x35d   :  { %3749 = vmatpush1.bf16.xpose.msra.mxu1 %v4677_v5  ;;  %v4747_v5 = vcombine.low %v3818_v59, %v3821_v0 }
 0x35e   :  { %3750 = vmatprep.subr.bf16.mxu1 %v4684_v7  ;;  %v4754_v7 = vcombine.high %v3824_v63, %v3827_v3 }
 0x365   :  { %3751 = vmatpush1.bf16.xpose.msra.mxu1 %v4683_v11 }
 0x366   :  { %3752 = vmatprep.subr.bf16.mxu1 %v4690_v13 }
 0x36d   :  { %3753 = vmatpush1.bf16.xpose.msra.mxu1 %v4689_v54 }
 0x36e   :  { %3754 = vmatprep.subr.bf16.mxu1 %v4696_v30  ;;  %v3885_v30 = vpack.c.b16 %v5717_v37, %v5717_v37 }
 0x375   :  { %3755 = vmatpush1.bf16.xpose.msra.mxu1 %v4695_v19 }
 0x376   :  { %3756 = vmatprep.subr.bf16.mxu1 %v4702_v27 }
 0x37d   :  { %3757 = vmatpush1.bf16.xpose.msra.mxu1 %v4701_v15 }
 0x37e   :  { %3758 = vmatprep.subr.bf16.mxu1 %v4708_v24 }
 0x385   :  { %3759 = vmatpush1.bf16.xpose.msra.mxu1 %v4707_v32 }
 0x386   :  { %3760 = vmatprep.subr.bf16.mxu1 %v4714_v10 }
 0x387   :  { %v5832_v8 = vpop.f32.mrb[16].mxu0 }
 0x388   :  { %v3742_v40 = vpop.f32.mrb[17].mxu0 }
 0x389   :  { %v3743_v60 = vpop.f32.mrb[18].mxu0 }
 0x38a   :  { %v3744_v31 = vpop.f32.mrb[19].mxu0 }
 0x38d   :  { %3761 = vmatpush1.bf16.xpose.msra.mxu1 %v4713_v21 }
 0x38e   :  { %4175 = vmatprep.subr.bf16.mxu1 %v4718_v12 }
 0x394   :  { %3779 = vmatmul.mubr.bf16.vlgmr.msra.gmra.mrb[24].mxu1 %v3418_v49 }
 0x395   :  { %4176 = vmatpush1.bf16.xpose.msra.mxu1 %v4717_v44  ;;  %4207 = vmatprep.mubr.bf16.mxu1 %v3886_v52 }
 0x396   :  { %4177 = vmatprep.subr.bf16.mxu1 %v4724_v35 }
 0x39d   :  { %4178 = vmatpush1.bf16.xpose.msra.mxu1 %v4723_v46 }
 0x39e   :  { %4179 = vmatprep.subr.bf16.mxu1 %v4730_v50 }
 0x3a5   :  { %4180 = vmatpush1.bf16.xpose.msra.mxu1 %v4729_v14 }
 0x3a6   :  { %4181 = vmatprep.subr.bf16.mxu1 %v4736_v23 }
 0x3a7   :  { %v2909_v28 = vpop.f32.mrb[12].mxu1 }
 0x3a8   :  { %v2910_v36 = vadd.f32 %v2909_v28, %v5823_v26  ;;  %v2911_v53 = vpop.f32.mrb[13].mxu1  ;;  %v3830_v26 = vld [vmem:[#allocation10 + $0x590] sm:$0xff] }
 0x3a9   :  { %v2912_v61 = vpop.f32.mrb[14].mxu1  ;;  %v4760_v11 = vcombine.high %v3830_v26, %v3833_v9  ;;  %v4759_v17 = vcombine.low %v3830_v26, %v3833_v9 }
 0x3aa   :  { %v2913_v58 = vpop.f32.mrb[15].mxu1  ;;  %v3233_v51 = vadd.f32 %v5812_v45, %v2910_v36 }
 0x3ad   :  { %4182 = vmatpush1.bf16.xpose.msra.mxu1 %v4735_v55 }
 0x3ae   :  { %4183 = vmatprep.subr.bf16.mxu1 %v4742_v16 }
 0x3b5   :  { %4184 = vmatpush1.bf16.xpose.msra.mxu1 %v4741_v2 }
 0x3b6   :  { %4185 = vmatprep.subr.bf16.mxu1 %v4748_v62 }
 0x3bd   :  { %4186 = vmatpush1.bf16.xpose.msra.mxu1 %v4747_v5 }
 0x3be   :  { %4187 = vmatprep.subr.bf16.mxu1 %v4754_v7 }
 0x3c5   :  { %4188 = vmatpush1.bf16.xpose.msra.mxu1 %v4753_v1 }
 0x3c6   :  { %4189 = vmatprep.subr.bf16.mxu1 %v4760_v11 }
 0x3c7   :  { %v4169_v45 = vpop.f32.mrb[20].mxu0 }
 0x3c8   :  { %v4171_v13 = vpop.f32.mrb[21].mxu0 }
 0x3c9   :  { %v4172_v6 = vpop.f32.mrb[22].mxu0 }
 0x3ca   :  { %v4173_v54 = vpop.f32.mrb[23].mxu0 }
 0x3cd   :  { %4190 = vmatpush1.bf16.xpose.msra.mxu1 %v4759_v17 }
 0x3d4   :  { %4208 = vmatmul.mubr.bf16.vlgmr.msra.gmra.mrb[28].mxu1 %v3885_v30 }
 0x3e7   :  { %v3272_v56 = vpop.f32.mrb[16].mxu1 }
 0x3e8   :  { %v3273_v57 = vadd.f32 %v3272_v56, %v3233_v51  ;;  %v3274_v19 = vpop.f32.mrb[17].mxu1 }
 0x3e9   :  { %v3275_v27 = vpop.f32.mrb[18].mxu1 }
 0x3ea   :  { %v3313_v42 = vadd.f32 %v5826_v25, %v3273_v57  ;;  %v3276_v34 = vpop.f32.mrb[19].mxu1 }
 0x408   :  { %v4249_v15 = vpop.f32.mrb[24].mxu0 }
 0x409   :  { %v4251_v24 = vpop.f32.mrb[25].mxu0 }
 0x40a   :  { %v4252_v22 = vpop.f32.mrb[26].mxu0 }
 0x40b   :  { %v4253_v18 = vpop.f32.mrb[27].mxu0 }
 0x427   :  { %v3700_v32 = vpop.f32.mrb[20].mxu1 }
 0x428   :  { %v3741_v10 = vadd.f32 %v5832_v8, %v3700_v32  ;;  %v3702_v38 = vpop.f32.mrb[21].mxu1 }
 0x429   :  { %v3703_v39 = vpop.f32.mrb[22].mxu1 }
 0x42a   :  { %v3704_v40 = vpop.f32.mrb[23].mxu1 }
 0x467   :  { %v3780_v60 = vpop.f32.mrb[24].mxu1 }
 0x468   :  { %v3781_v37 = vadd.f32 %v3780_v60, %v3741_v10  ;;  %v3782_v21 = vpop.f32.mrb[25].mxu1 }
 0x469   :  { %v3783_v31 = vpop.f32.mrb[26].mxu1 }
 0x46a   :  { %v3786_v12 = vadd.f32 %v3781_v37, %v3313_v42  ;;  %v3784_v41 = vpop.f32.mrb[27].mxu1 }
 0x4a7   :  { %v4209_v43 = vpop.f32.mrb[28].mxu1 }
 0x4a8   :  { %v4210_v44 = vadd.f32 %v4209_v43, %v4169_v45  ;;  %v4211_v25 = vpop.f32.mrb[29].mxu1 }
 0x4a9   :  { %v4212_v49 = vpop.f32.mrb[30].mxu1 }
 0x4aa   :  { %v4250_v35 = vadd.f32 %v4249_v15, %v4210_v44  ;;  %v4213_v52 = vpop.f32.mrb[31].mxu1 }
 0x4ac   :  { %v4255_v47 = vadd.f32 %v4250_v35, %v3786_v12 }
 0x4ae   :  { %v4263_v8 = vadd.f32 %v4763_v4, %v4255_v47 }
 0x4b0   :  { %4264 = vst [vmem:[#allocation13] sm:$0x3] %v4263_v8 }
 0x4b1   :  { %5394 = shalt.err (!%p5391_p10)
}
 0x4b2   :  { %s5395_s23 = scalar_lea.hbm %s5862_s6, 32 }
 0x4b3   :  { %p5396_p11 = scmp.ne.s32.totalorder %s5862_s6, %s5395_s23  ;;  %p5399_p12 = scmp.lt.u32.totalorder %s5395_s23, %s5862_s6 }
 0x4b5   :  { %p5401_p13 = pnand %p5399_p12, %p5396_p11 }
 0x4b7   :  { %5404 = shalt.err (!%p5401_p13)
}
 0x4b8   :  { %4274 = dma.vmem_to_hbm [thread:$0]  %s4272_s1, 32, %s5862_s6, [#allocation4]  }
 0x4b9   :  { %5413 = dma.done.wait [#allocation4], 32  }
 0x4ba   :  { %5414 = vsyncadd [#allocation4], 4294967264 }
 0x4bb   :  { %4278 = vsyncpa [#allocation3], 1 }
 0x4bc   :  { %4279 = vsyncpa [#allocation6], 1 }
 0x4bd   :  { %4280 = vsyncpa [#allocation9], 1 }
 0x4be   :  { %4281 = vsyncpa [#allocation12], 1 }
 0x4bf   :  { %4282 = vsyncpa [#allocation4], 1 }

</bundles_post_ra>
